<compile_context>
chip_gen: v6e
topology: v6e:2x2x1
jax: 0.10.0
libtpu: 0.0.40
codegen_flags: <defaults>
</compile_context>

<pallas_src>
import functools

import jax
import jax.numpy as jnp
from jax import lax
from jax.experimental import pallas as pl
from jax.experimental.pallas import tpu as pltpu


def rb_kernel(x_ref, w1_ref, b1_ref, w2_ref, b2_ref, out_ref, *,
              B, H, W, HW, HWp, mm_dtype):
    """Fused residual block for a batch of B images.

    x_ref:   (B, C, HWp)  images; channels on sublanes, padded pixels on lanes
    w*_ref:  (9, C, C)    conv weights w[k, cout, cin], k = ki*3 + kj
    b*_ref:  (C, 1)       conv bias (f32)
    out_ref: (B, C, HWp)
    """
    C = out_ref.shape[1]
    L = B * HWp

    # ---- lane-concat the B images into one (C, B*HWp) slab (stays in VMEM) --
    if B == 1:
        x = x_ref[0]
    else:
        x = jnp.concatenate([x_ref[b] for b in range(B)], axis=1)

    # ---- 3x3 taps & hoisted validity masks (shared by both convs) -----------
    # Output pixel q (local, per padded image) reads input pixel q + off,
    # off = di*W + dj.  Out-of-image taps must be zero (PyTorch padding=1).
    taps = [(ki - 1, kj - 1) for ki in range(3) for kj in range(3)]
    q = lax.broadcasted_iota(jnp.int32, (1, L), 1) % HWp   # local pixel index
    col = q % W
    masks = []
    for di, dj in taps:
        if di == 0 and dj == 0:
            masks.append(None)                    # center tap: always valid
            continue
        off = di * W + dj
        valid = (q + off >= 0) & (q + off < HW)   # rows above/below the image
        if dj == 1:
            valid = valid & (col < W - 1)         # right-edge wrap
        elif dj == -1:
            valid = valid & (col > 0)             # left-edge wrap
        masks.append(jnp.broadcast_to(valid, (C, L)))   # pre-broadcast once

    def conv3x3(a, w_ref):
        # 9 accumulating (C,C)x(C,L) MXU matmuls -- no materialized im2col.
        acc = jnp.dot(w_ref[4], a.astype(mm_dtype),           # center tap:
                      preferred_element_type=jnp.float32)     # no roll, no mask
        for k, (di, dj) in enumerate(taps):
            if di == 0 and dj == 0:
                continue
            off = di * W + dj
            s = pltpu.roll(a, (-off) % L, axis=1)             # XLU lane rotate
            t = jnp.where(masks[k], s, 0.0)                   # VPU select
            acc = acc + jnp.dot(w_ref[k], t.astype(mm_dtype),
                                preferred_element_type=jnp.float32)
        return acc                                            # (C, L) f32

    # conv1 -> bias -> ReLU   (hidden never leaves VMEM)
    h = jnp.maximum(conv3x3(x, w1_ref) + b1_ref[...], 0.0)
    # conv2 -> bias -> residual add (residual read from the resident slab)
    y = (conv3x3(h, w2_ref) + b2_ref[...] + x).astype(out_ref.dtype)

    # ---- write each image's (C, HWp) lane slice (aligned, unmasked stores) --
    for b in range(B):
        out_ref[b] = y[:, b * HWp:(b + 1) * HWp]


def _pick_images_per_step(N, C, HWp, itemsize=4,
                          vmem_budget=24 * 1024 * 1024):
    """Images per grid step: amortize per-step overhead and grow DMAs while
    keeping >=4 grid steps when N allows (>=2 steps/TC on v7x, pipeline overlap
    on v5e/v6e) and staying well inside the VMEM budget."""
    min_steps = 4 if N >= 4 else min(N, 2)
    best = 1
    for B in range(1, N + 1):
        if N % B:
            continue
        if N // B < min_steps:
            continue
        # x block + out block (double-buffered) + concat slab + h + acc temps.
        if 9 * B * C * HWp * itemsize > vmem_budget:
            continue
        best = B
    return best


@functools.partial(jax.jit, static_argnames=("matmul_dtype",))
def rb_forward(x, w1, b1, w2, b2, *, matmul_dtype=jnp.float32):
    """RB forward.

    x:  (N, C, H, W) float32 (NCHW, as in PyTorch)
    w*: (C, C, 3, 3) float32 (PyTorch Conv2d weight layout, OIHW)
    b*: (C,)         float32
    matmul_dtype: jnp.float32 (exact) or jnp.bfloat16 (bf16 MXU operands with
                  f32 accumulation; ~2-3x MXU throughput on v5e/v6e/v7x).
    """
    N, C, H, W = x.shape
    HW = H * W
    HWp = ((HW + 127) // 128) * 128            # lane-dense pixel axis

    x_flat = x.reshape(N, C, HW)               # free contiguous reshape
    if HWp != HW:
        x_flat = jnp.pad(x_flat, ((0, 0), (0, 0), (0, HWp - HW)))

    # Weights as (9, C, C): w[k, cout, cin], k = ki*3 + kj.  Cast once here so
    # the kernel's MXU operands are already in matmul_dtype.
    w1s = jnp.transpose(w1, (2, 3, 0, 1)).reshape(9, C, C).astype(matmul_dtype)
    w2s = jnp.transpose(w2, (2, 3, 0, 1)).reshape(9, C, C).astype(matmul_dtype)
    b1c = b1.reshape(C, 1).astype(jnp.float32)
    b2c = b2.reshape(C, 1).astype(jnp.float32)

    B = _pick_images_per_step(N, C, HWp)
    G = N // B
    # TODO(synk): for a single image too large for the VMEM budget (huge C*H*W)
    # add a second spatial grid axis tiling HWp instead of whole-image blocks.

    kernel = functools.partial(rb_kernel, B=B, H=H, W=W, HW=HW, HWp=HWp,
                               mm_dtype=matmul_dtype)

    cost = pl.CostEstimate(
        flops=2 * 2 * N * HW * (9 * C) * C,                 # 2 convs, 2*MACs
        transcendentals=0,
        bytes_accessed=4 * (2 * N * C * HWp + 2 * C)
        + 2 * 9 * C * C * jnp.dtype(matmul_dtype).itemsize,
    )

    y_flat = pl.pallas_call(
        kernel,
        out_shape=jax.ShapeDtypeStruct((N, C, HWp), x.dtype),
        grid_spec=pltpu.PrefetchScalarGridSpec(
            num_scalar_prefetch=0,
            grid=(G,),
            in_specs=[
                pl.BlockSpec((B, C, HWp), lambda n: (n, 0, 0)),
                pl.BlockSpec((9, C, C), lambda n: (0, 0, 0)),
                pl.BlockSpec((C, 1), lambda n: (0, 0)),
                pl.BlockSpec((9, C, C), lambda n: (0, 0, 0)),
                pl.BlockSpec((C, 1), lambda n: (0, 0)),
            ],
            out_specs=pl.BlockSpec((B, C, HWp), lambda n: (n, 0, 0)),
        ),
        compiler_params=pltpu.CompilerParams(
            dimension_semantics=("parallel",),          # megacore / 2 TCs
            vmem_limit_bytes=48 * 1024 * 1024,          # headroom on v7x 64MiB
        ),
        cost_estimate=cost,
    )(x_flat, w1s, b1c, w2s, b2c)

    return y_flat[:, :, :HW].reshape(N, C, H, W)


def rb_reference(x, w1, b1, w2, b2):
    """Pure-JAX reference (NCHW / OIHW convs), matches the PyTorch module."""
    dn = ("NCHW", "OIHW", "NCHW")
    h = lax.conv_general_dilated(
        x, w1, (1, 1), "SAME", dimension_numbers=dn,
        precision=lax.Precision.HIGHEST) + b1[None, :, None, None]
    h = jnp.maximum(h, 0.0)
    y = lax.conv_general_dilated(
        h, w2, (1, 1), "SAME", dimension_numbers=dn,
        precision=lax.Precision.HIGHEST) + b2[None, :, None, None]
    return y + x


def _make_inputs(key, N, C, H, W):
    kx, kw1, kb1, kw2, kb2 = jax.random.split(key, 5)
    x = jax.random.normal(kx, (N, C, H, W), dtype=jnp.float32)
    scale = 1.0 / (3.0 * 3.0 * C) ** 0.5
    w1 = jax.random.normal(kw1, (C, C, 3, 3), dtype=jnp.float32) * scale
    b1 = jax.random.normal(kb1, (C,), dtype=jnp.float32) * 0.1
    w2 = jax.random.normal(kw2, (C, C, 3, 3), dtype=jnp.float32) * scale
    b2 = jax.random.normal(kb2, (C,), dtype=jnp.float32) * 0.1
    return x, w1, b1, w2, b2


if __name__ == "__main__":
    key_main, key_small = jax.random.split(jax.random.PRNGKey(0))

    # Primary shape: N=8 images, C=8 feats, 16x16 -> B=2 images/step, 4 steps.
    x, w1, b1, w2, b2 = _make_inputs(key_main, 8, 8, 16, 16)
    y = rb_forward(x, w1, b1, w2, b2)
    jax.block_until_ready(y)
    y_ref = rb_reference(x, w1, b1, w2, b2)
    assert y.shape == x.shape, y.shape
    assert jnp.allclose(y, y_ref, rtol=1e-4, atol=1e-4), float(
        jnp.max(jnp.abs(y - y_ref)))

    # bf16 MXU-operand path (f32 accumulation) -- looser tolerance.
    y_bf = rb_forward(x, w1, b1, w2, b2, matmul_dtype=jnp.bfloat16)
    jax.block_until_ready(y_bf)
    assert jnp.allclose(y_bf, y_ref, rtol=5e-2, atol=5e-2), float(
        jnp.max(jnp.abs(y_bf - y_ref)))

    # Non-multiple-of-128 spatial size (10x10 -> padded to 128 lanes), odd N.
    x2, w12, b12, w22, b22 = _make_inputs(key_small, 3, 8, 10, 10)
    y2 = rb_forward(x2, w12, b12, w22, b22)
    jax.block_until_ready(y2)
    y2_ref = rb_reference(x2, w12, b12, w22, b22)
    assert y2.shape == x2.shape, y2.shape
    assert jnp.allclose(y2, y2_ref, rtol=1e-4, atol=1e-4), float(
        jnp.max(jnp.abs(y2 - y2_ref)))

    print("KERNEL_OK")
</pallas_src>

<mosaic_0001>
module attributes {stable_mosaic.version = 11 : i64} {
  func.func @rb_kernel(%arg0: i32, %arg1: memref<2x8x256xf32, #tpu.memory_space<vmem>>, %arg2: memref<9x8x8xf32, #tpu.memory_space<vmem>>, %arg3: memref<8x1xf32, #tpu.memory_space<vmem>>, %arg4: memref<9x8x8xf32, #tpu.memory_space<vmem>>, %arg5: memref<8x1xf32, #tpu.memory_space<vmem>>, %arg6: memref<2x8x256xf32, #tpu.memory_space<vmem>>) attributes {dimension_semantics = [#tpu.dimension_semantics<parallel>], iteration_bounds = array<i64: 4>, scalar_prefetch = 0 : i64, scratch_operands = 0 : i64, tpu.core_type = #tpu.core_type<tc>, window_params = [{transform_indices = @transform_0, window_bounds = array<i64: 2, 8, 256>}, {pipeline_mode = #tpu.pipeline_mode<synchronous>, transform_indices = @transform_1, window_bounds = array<i64: 9, 8, 8>}, {pipeline_mode = #tpu.pipeline_mode<synchronous>, transform_indices = @transform_2, window_bounds = array<i64: 8, 1>}, {pipeline_mode = #tpu.pipeline_mode<synchronous>, transform_indices = @transform_3, window_bounds = array<i64: 9, 8, 8>}, {pipeline_mode = #tpu.pipeline_mode<synchronous>, transform_indices = @transform_4, window_bounds = array<i64: 8, 1>}, {transform_indices = @transform_5, window_bounds = array<i64: 2, 8, 256>}]} {
    %c0 = arith.constant 0 : index
    %c0_0 = arith.constant 0 : index
    %c0_1 = arith.constant 0 : index
    %0 = vector.load %arg1[%c0, %c0_0, %c0_1] : memref<2x8x256xf32, #tpu.memory_space<vmem>>, vector<1x8x256xf32>
    %1 = vector.shape_cast %0 : vector<1x8x256xf32> to vector<8x256xf32>
    %c1 = arith.constant 1 : index
    %c0_2 = arith.constant 0 : index
    %c0_3 = arith.constant 0 : index
    %2 = vector.load %arg1[%c1, %c0_2, %c0_3] : memref<2x8x256xf32, #tpu.memory_space<vmem>>, vector<1x8x256xf32>
    %3 = vector.shape_cast %2 : vector<1x8x256xf32> to vector<8x256xf32>
    %4 = tpu.concatenate %1, %3 in 1 : vector<8x256xf32>, vector<8x256xf32> -> vector<8x512xf32>
    %5 = tpu.iota {dimensions = array<i32: 1>} : vector<1x512xi32>
    %c256_i32 = arith.constant 256 : i32
    %c0_i32 = arith.constant 0 : i32
    %6 = arith.cmpi eq, %c256_i32, %c0_i32 : i32
    %c1_i32 = arith.constant 1 : i32
    %7 = arith.select %6, %c1_i32, %c256_i32 : i32
    %8 = vector.broadcast %7 : i32 to vector<1x512xi32>
    %9 = arith.remsi %5, %8 : vector<1x512xi32>
    %c0_i32_4 = arith.constant 0 : i32
    %10 = vector.broadcast %c0_i32_4 : i32 to vector<1x512xi32>
    %11 = arith.cmpi ne, %9, %10 : vector<1x512xi32>
    %c0_i32_5 = arith.constant 0 : i32
    %12 = vector.broadcast %c0_i32_5 : i32 to vector<1x512xi32>
    %13 = arith.cmpi slt, %9, %12 : vector<1x512xi32>
    %c0_i32_6 = arith.constant 0 : i32
    %14 = arith.cmpi slt, %7, %c0_i32_6 : i32
    %15 = vector.broadcast %14 : i1 to vector<1x512xi1>
    %16 = vector.broadcast %15 : vector<1x512xi1> to vector<1x512xi1>
    %17 = arith.xori %13, %16 : vector<1x512xi1>
    %18 = arith.andi %17, %11 : vector<1x512xi1>
    %19 = vector.broadcast %7 : i32 to vector<1x512xi32>
    %20 = arith.addi %9, %19 : vector<1x512xi32>
    %21 = arith.select %18, %20, %9 : vector<1x512xi1>, vector<1x512xi32>
    %c16_i32 = arith.constant 16 : i32
    %c0_i32_7 = arith.constant 0 : i32
    %22 = arith.cmpi eq, %c16_i32, %c0_i32_7 : i32
    %c1_i32_8 = arith.constant 1 : i32
    %23 = arith.select %22, %c1_i32_8, %c16_i32 : i32
    %24 = vector.broadcast %23 : i32 to vector<1x512xi32>
    %25 = arith.remsi %21, %24 : vector<1x512xi32>
    %c0_i32_9 = arith.constant 0 : i32
    %26 = vector.broadcast %c0_i32_9 : i32 to vector<1x512xi32>
    %27 = arith.cmpi ne, %25, %26 : vector<1x512xi32>
    %c0_i32_10 = arith.constant 0 : i32
    %28 = vector.broadcast %c0_i32_10 : i32 to vector<1x512xi32>
    %29 = arith.cmpi slt, %25, %28 : vector<1x512xi32>
    %c0_i32_11 = arith.constant 0 : i32
    %30 = arith.cmpi slt, %23, %c0_i32_11 : i32
    %31 = vector.broadcast %30 : i1 to vector<1x512xi1>
    %32 = vector.broadcast %31 : vector<1x512xi1> to vector<1x512xi1>
    %33 = arith.xori %29, %32 : vector<1x512xi1>
    %34 = arith.andi %33, %27 : vector<1x512xi1>
    %35 = vector.broadcast %23 : i32 to vector<1x512xi32>
    %36 = arith.addi %25, %35 : vector<1x512xi32>
    %37 = arith.select %34, %36, %25 : vector<1x512xi1>, vector<1x512xi32>
    %c-17_i32 = arith.constant -17 : i32
    %38 = vector.broadcast %c-17_i32 : i32 to vector<1x512xi32>
    %39 = arith.addi %21, %38 : vector<1x512xi32>
    %c0_i32_12 = arith.constant 0 : i32
    %40 = vector.broadcast %c0_i32_12 : i32 to vector<1x512xi32>
    %41 = arith.cmpi sge, %39, %40 : vector<1x512xi32>
    %c-17_i32_13 = arith.constant -17 : i32
    %42 = vector.broadcast %c-17_i32_13 : i32 to vector<1x512xi32>
    %43 = arith.addi %21, %42 : vector<1x512xi32>
    %c256_i32_14 = arith.constant 256 : i32
    %44 = vector.broadcast %c256_i32_14 : i32 to vector<1x512xi32>
    %45 = arith.cmpi slt, %43, %44 : vector<1x512xi32>
    %46 = arith.andi %41, %45 : vector<1x512xi1>
    %c0_i32_15 = arith.constant 0 : i32
    %47 = vector.broadcast %c0_i32_15 : i32 to vector<1x512xi32>
    %48 = arith.cmpi sgt, %37, %47 : vector<1x512xi32>
    %49 = arith.andi %46, %48 : vector<1x512xi1>
    %50 = vector.shape_cast %49 : vector<1x512xi1> to vector<1x512xi1>
    %51 = vector.broadcast %50 : vector<1x512xi1> to vector<8x512xi1>
    %c-16_i32 = arith.constant -16 : i32
    %52 = vector.broadcast %c-16_i32 : i32 to vector<1x512xi32>
    %53 = arith.addi %21, %52 : vector<1x512xi32>
    %c0_i32_16 = arith.constant 0 : i32
    %54 = vector.broadcast %c0_i32_16 : i32 to vector<1x512xi32>
    %55 = arith.cmpi sge, %53, %54 : vector<1x512xi32>
    %c-16_i32_17 = arith.constant -16 : i32
    %56 = vector.broadcast %c-16_i32_17 : i32 to vector<1x512xi32>
    %57 = arith.addi %21, %56 : vector<1x512xi32>
    %c256_i32_18 = arith.constant 256 : i32
    %58 = vector.broadcast %c256_i32_18 : i32 to vector<1x512xi32>
    %59 = arith.cmpi slt, %57, %58 : vector<1x512xi32>
    %60 = arith.andi %55, %59 : vector<1x512xi1>
    %61 = vector.shape_cast %60 : vector<1x512xi1> to vector<1x512xi1>
    %62 = vector.broadcast %61 : vector<1x512xi1> to vector<8x512xi1>
    %c-15_i32 = arith.constant -15 : i32
    %63 = vector.broadcast %c-15_i32 : i32 to vector<1x512xi32>
    %64 = arith.addi %21, %63 : vector<1x512xi32>
    %c0_i32_19 = arith.constant 0 : i32
    %65 = vector.broadcast %c0_i32_19 : i32 to vector<1x512xi32>
    %66 = arith.cmpi sge, %64, %65 : vector<1x512xi32>
    %c-15_i32_20 = arith.constant -15 : i32
    %67 = vector.broadcast %c-15_i32_20 : i32 to vector<1x512xi32>
    %68 = arith.addi %21, %67 : vector<1x512xi32>
    %c256_i32_21 = arith.constant 256 : i32
    %69 = vector.broadcast %c256_i32_21 : i32 to vector<1x512xi32>
    %70 = arith.cmpi slt, %68, %69 : vector<1x512xi32>
    %71 = arith.andi %66, %70 : vector<1x512xi1>
    %c15_i32 = arith.constant 15 : i32
    %72 = vector.broadcast %c15_i32 : i32 to vector<1x512xi32>
    %73 = arith.cmpi slt, %37, %72 : vector<1x512xi32>
    %74 = arith.andi %71, %73 : vector<1x512xi1>
    %75 = vector.shape_cast %74 : vector<1x512xi1> to vector<1x512xi1>
    %76 = vector.broadcast %75 : vector<1x512xi1> to vector<8x512xi1>
    %c-1_i32 = arith.constant -1 : i32
    %77 = vector.broadcast %c-1_i32 : i32 to vector<1x512xi32>
    %78 = arith.addi %21, %77 : vector<1x512xi32>
    %c0_i32_22 = arith.constant 0 : i32
    %79 = vector.broadcast %c0_i32_22 : i32 to vector<1x512xi32>
    %80 = arith.cmpi sge, %78, %79 : vector<1x512xi32>
    %c-1_i32_23 = arith.constant -1 : i32
    %81 = vector.broadcast %c-1_i32_23 : i32 to vector<1x512xi32>
    %82 = arith.addi %21, %81 : vector<1x512xi32>
    %c256_i32_24 = arith.constant 256 : i32
    %83 = vector.broadcast %c256_i32_24 : i32 to vector<1x512xi32>
    %84 = arith.cmpi slt, %82, %83 : vector<1x512xi32>
    %85 = arith.andi %80, %84 : vector<1x512xi1>
    %c0_i32_25 = arith.constant 0 : i32
    %86 = vector.broadcast %c0_i32_25 : i32 to vector<1x512xi32>
    %87 = arith.cmpi sgt, %37, %86 : vector<1x512xi32>
    %88 = arith.andi %85, %87 : vector<1x512xi1>
    %89 = vector.shape_cast %88 : vector<1x512xi1> to vector<1x512xi1>
    %90 = vector.broadcast %89 : vector<1x512xi1> to vector<8x512xi1>
    %c1_i32_26 = arith.constant 1 : i32
    %91 = vector.broadcast %c1_i32_26 : i32 to vector<1x512xi32>
    %92 = arith.addi %21, %91 : vector<1x512xi32>
    %c0_i32_27 = arith.constant 0 : i32
    %93 = vector.broadcast %c0_i32_27 : i32 to vector<1x512xi32>
    %94 = arith.cmpi sge, %92, %93 : vector<1x512xi32>
    %c1_i32_28 = arith.constant 1 : i32
    %95 = vector.broadcast %c1_i32_28 : i32 to vector<1x512xi32>
    %96 = arith.addi %21, %95 : vector<1x512xi32>
    %c256_i32_29 = arith.constant 256 : i32
    %97 = vector.broadcast %c256_i32_29 : i32 to vector<1x512xi32>
    %98 = arith.cmpi slt, %96, %97 : vector<1x512xi32>
    %99 = arith.andi %94, %98 : vector<1x512xi1>
    %c15_i32_30 = arith.constant 15 : i32
    %100 = vector.broadcast %c15_i32_30 : i32 to vector<1x512xi32>
    %101 = arith.cmpi slt, %37, %100 : vector<1x512xi32>
    %102 = arith.andi %99, %101 : vector<1x512xi1>
    %103 = vector.shape_cast %102 : vector<1x512xi1> to vector<1x512xi1>
    %104 = vector.broadcast %103 : vector<1x512xi1> to vector<8x512xi1>
    %c15_i32_31 = arith.constant 15 : i32
    %105 = vector.broadcast %c15_i32_31 : i32 to vector<1x512xi32>
    %106 = arith.addi %21, %105 : vector<1x512xi32>
    %c0_i32_32 = arith.constant 0 : i32
    %107 = vector.broadcast %c0_i32_32 : i32 to vector<1x512xi32>
    %108 = arith.cmpi sge, %106, %107 : vector<1x512xi32>
    %c15_i32_33 = arith.constant 15 : i32
    %109 = vector.broadcast %c15_i32_33 : i32 to vector<1x512xi32>
    %110 = arith.addi %21, %109 : vector<1x512xi32>
    %c256_i32_34 = arith.constant 256 : i32
    %111 = vector.broadcast %c256_i32_34 : i32 to vector<1x512xi32>
    %112 = arith.cmpi slt, %110, %111 : vector<1x512xi32>
    %113 = arith.andi %108, %112 : vector<1x512xi1>
    %c0_i32_35 = arith.constant 0 : i32
    %114 = vector.broadcast %c0_i32_35 : i32 to vector<1x512xi32>
    %115 = arith.cmpi sgt, %37, %114 : vector<1x512xi32>
    %116 = arith.andi %113, %115 : vector<1x512xi1>
    %117 = vector.shape_cast %116 : vector<1x512xi1> to vector<1x512xi1>
    %118 = vector.broadcast %117 : vector<1x512xi1> to vector<8x512xi1>
    %c16_i32_36 = arith.constant 16 : i32
    %119 = vector.broadcast %c16_i32_36 : i32 to vector<1x512xi32>
    %120 = arith.addi %21, %119 : vector<1x512xi32>
    %c0_i32_37 = arith.constant 0 : i32
    %121 = vector.broadcast %c0_i32_37 : i32 to vector<1x512xi32>
    %122 = arith.cmpi sge, %120, %121 : vector<1x512xi32>
    %c16_i32_38 = arith.constant 16 : i32
    %123 = vector.broadcast %c16_i32_38 : i32 to vector<1x512xi32>
    %124 = arith.addi %21, %123 : vector<1x512xi32>
    %c256_i32_39 = arith.constant 256 : i32
    %125 = vector.broadcast %c256_i32_39 : i32 to vector<1x512xi32>
    %126 = arith.cmpi slt, %124, %125 : vector<1x512xi32>
    %127 = arith.andi %122, %126 : vector<1x512xi1>
    %128 = vector.shape_cast %127 : vector<1x512xi1> to vector<1x512xi1>
    %129 = vector.broadcast %128 : vector<1x512xi1> to vector<8x512xi1>
    %c17_i32 = arith.constant 17 : i32
    %130 = vector.broadcast %c17_i32 : i32 to vector<1x512xi32>
    %131 = arith.addi %21, %130 : vector<1x512xi32>
    %c0_i32_40 = arith.constant 0 : i32
    %132 = vector.broadcast %c0_i32_40 : i32 to vector<1x512xi32>
    %133 = arith.cmpi sge, %131, %132 : vector<1x512xi32>
    %c17_i32_41 = arith.constant 17 : i32
    %134 = vector.broadcast %c17_i32_41 : i32 to vector<1x512xi32>
    %135 = arith.addi %21, %134 : vector<1x512xi32>
    %c256_i32_42 = arith.constant 256 : i32
    %136 = vector.broadcast %c256_i32_42 : i32 to vector<1x512xi32>
    %137 = arith.cmpi slt, %135, %136 : vector<1x512xi32>
    %138 = arith.andi %133, %137 : vector<1x512xi1>
    %c15_i32_43 = arith.constant 15 : i32
    %139 = vector.broadcast %c15_i32_43 : i32 to vector<1x512xi32>
    %140 = arith.cmpi slt, %37, %139 : vector<1x512xi32>
    %141 = arith.andi %138, %140 : vector<1x512xi1>
    %142 = vector.shape_cast %141 : vector<1x512xi1> to vector<1x512xi1>
    %143 = vector.broadcast %142 : vector<1x512xi1> to vector<8x512xi1>
    %c4 = arith.constant 4 : index
    %c0_44 = arith.constant 0 : index
    %c0_45 = arith.constant 0 : index
    %144 = vector.load %arg2[%c4, %c0_44, %c0_45] : memref<9x8x8xf32, #tpu.memory_space<vmem>>, vector<1x8x8xf32>
    %145 = vector.shape_cast %144 : vector<1x8x8xf32> to vector<8x8xf32>
    %cst = arith.constant dense<0.000000e+00> : vector<8x512xf32>
    %146 = tpu.matmul %145, %4, %cst {dimension_numbers = #tpu.dot_dimension_numbers<[1], [0], [0], [1], [0, 0, 1, 1], [], []>} : vector<8x8xf32>, vector<8x512xf32>, vector<8x512xf32> -> vector<8x512xf32>
    %c17_i32_46 = arith.constant 17 : i32
    %147 = tpu.dynamic_rotate %4 by %c17_i32_46 dim 1 : vector<8x512xf32>, i32 -> vector<8x512xf32>
    %cst_47 = arith.constant 0.000000e+00 : f32
    %148 = vector.broadcast %cst_47 : f32 to vector<8x512xf32>
    %149 = arith.select %51, %147, %148 : vector<8x512xi1>, vector<8x512xf32>
    %c0_48 = arith.constant 0 : index
    %c0_49 = arith.constant 0 : index
    %c0_50 = arith.constant 0 : index
    %150 = vector.load %arg2[%c0_48, %c0_49, %c0_50] : memref<9x8x8xf32, #tpu.memory_space<vmem>>, vector<1x8x8xf32>
    %151 = vector.shape_cast %150 : vector<1x8x8xf32> to vector<8x8xf32>
    %cst_51 = arith.constant dense<0.000000e+00> : vector<8x512xf32>
    %152 = tpu.matmul %151, %149, %cst_51 {dimension_numbers = #tpu.dot_dimension_numbers<[1], [0], [0], [1], [0, 0, 1, 1], [], []>} : vector<8x8xf32>, vector<8x512xf32>, vector<8x512xf32> -> vector<8x512xf32>
    %153 = arith.addf %146, %152 : vector<8x512xf32>
    %c16_i32_52 = arith.constant 16 : i32
    %154 = tpu.dynamic_rotate %4 by %c16_i32_52 dim 1 : vector<8x512xf32>, i32 -> vector<8x512xf32>
    %cst_53 = arith.constant 0.000000e+00 : f32
    %155 = vector.broadcast %cst_53 : f32 to vector<8x512xf32>
    %156 = arith.select %62, %154, %155 : vector<8x512xi1>, vector<8x512xf32>
    %c1_54 = arith.constant 1 : index
    %c0_55 = arith.constant 0 : index
    %c0_56 = arith.constant 0 : index
    %157 = vector.load %arg2[%c1_54, %c0_55, %c0_56] : memref<9x8x8xf32, #tpu.memory_space<vmem>>, vector<1x8x8xf32>
    %158 = vector.shape_cast %157 : vector<1x8x8xf32> to vector<8x8xf32>
    %cst_57 = arith.constant dense<0.000000e+00> : vector<8x512xf32>
    %159 = tpu.matmul %158, %156, %cst_57 {dimension_numbers = #tpu.dot_dimension_numbers<[1], [0], [0], [1], [0, 0, 1, 1], [], []>} : vector<8x8xf32>, vector<8x512xf32>, vector<8x512xf32> -> vector<8x512xf32>
    %160 = arith.addf %153, %159 : vector<8x512xf32>
    %c15_i32_58 = arith.constant 15 : i32
    %161 = tpu.dynamic_rotate %4 by %c15_i32_58 dim 1 : vector<8x512xf32>, i32 -> vector<8x512xf32>
    %cst_59 = arith.constant 0.000000e+00 : f32
    %162 = vector.broadcast %cst_59 : f32 to vector<8x512xf32>
    %163 = arith.select %76, %161, %162 : vector<8x512xi1>, vector<8x512xf32>
    %c2 = arith.constant 2 : index
    %c0_60 = arith.constant 0 : index
    %c0_61 = arith.constant 0 : index
    %164 = vector.load %arg2[%c2, %c0_60, %c0_61] : memref<9x8x8xf32, #tpu.memory_space<vmem>>, vector<1x8x8xf32>
    %165 = vector.shape_cast %164 : vector<1x8x8xf32> to vector<8x8xf32>
    %cst_62 = arith.constant dense<0.000000e+00> : vector<8x512xf32>
    %166 = tpu.matmul %165, %163, %cst_62 {dimension_numbers = #tpu.dot_dimension_numbers<[1], [0], [0], [1], [0, 0, 1, 1], [], []>} : vector<8x8xf32>, vector<8x512xf32>, vector<8x512xf32> -> vector<8x512xf32>
    %167 = arith.addf %160, %166 : vector<8x512xf32>
    %c1_i32_63 = arith.constant 1 : i32
    %168 = tpu.dynamic_rotate %4 by %c1_i32_63 dim 1 : vector<8x512xf32>, i32 -> vector<8x512xf32>
    %cst_64 = arith.constant 0.000000e+00 : f32
    %169 = vector.broadcast %cst_64 : f32 to vector<8x512xf32>
    %170 = arith.select %90, %168, %169 : vector<8x512xi1>, vector<8x512xf32>
    %c3 = arith.constant 3 : index
    %c0_65 = arith.constant 0 : index
    %c0_66 = arith.constant 0 : index
    %171 = vector.load %arg2[%c3, %c0_65, %c0_66] : memref<9x8x8xf32, #tpu.memory_space<vmem>>, vector<1x8x8xf32>
    %172 = vector.shape_cast %171 : vector<1x8x8xf32> to vector<8x8xf32>
    %cst_67 = arith.constant dense<0.000000e+00> : vector<8x512xf32>
    %173 = tpu.matmul %172, %170, %cst_67 {dimension_numbers = #tpu.dot_dimension_numbers<[1], [0], [0], [1], [0, 0, 1, 1], [], []>} : vector<8x8xf32>, vector<8x512xf32>, vector<8x512xf32> -> vector<8x512xf32>
    %174 = arith.addf %167, %173 : vector<8x512xf32>
    %c511_i32 = arith.constant 511 : i32
    %175 = tpu.dynamic_rotate %4 by %c511_i32 dim 1 : vector<8x512xf32>, i32 -> vector<8x512xf32>
    %cst_68 = arith.constant 0.000000e+00 : f32
    %176 = vector.broadcast %cst_68 : f32 to vector<8x512xf32>
    %177 = arith.select %104, %175, %176 : vector<8x512xi1>, vector<8x512xf32>
    %c5 = arith.constant 5 : index
    %c0_69 = arith.constant 0 : index
    %c0_70 = arith.constant 0 : index
    %178 = vector.load %arg2[%c5, %c0_69, %c0_70] : memref<9x8x8xf32, #tpu.memory_space<vmem>>, vector<1x8x8xf32>
    %179 = vector.shape_cast %178 : vector<1x8x8xf32> to vector<8x8xf32>
    %cst_71 = arith.constant dense<0.000000e+00> : vector<8x512xf32>
    %180 = tpu.matmul %179, %177, %cst_71 {dimension_numbers = #tpu.dot_dimension_numbers<[1], [0], [0], [1], [0, 0, 1, 1], [], []>} : vector<8x8xf32>, vector<8x512xf32>, vector<8x512xf32> -> vector<8x512xf32>
    %181 = arith.addf %174, %180 : vector<8x512xf32>
    %c497_i32 = arith.constant 497 : i32
    %182 = tpu.dynamic_rotate %4 by %c497_i32 dim 1 : vector<8x512xf32>, i32 -> vector<8x512xf32>
    %cst_72 = arith.constant 0.000000e+00 : f32
    %183 = vector.broadcast %cst_72 : f32 to vector<8x512xf32>
    %184 = arith.select %118, %182, %183 : vector<8x512xi1>, vector<8x512xf32>
    %c6 = arith.constant 6 : index
    %c0_73 = arith.constant 0 : index
    %c0_74 = arith.constant 0 : index
    %185 = vector.load %arg2[%c6, %c0_73, %c0_74] : memref<9x8x8xf32, #tpu.memory_space<vmem>>, vector<1x8x8xf32>
    %186 = vector.shape_cast %185 : vector<1x8x8xf32> to vector<8x8xf32>
    %cst_75 = arith.constant dense<0.000000e+00> : vector<8x512xf32>
    %187 = tpu.matmul %186, %184, %cst_75 {dimension_numbers = #tpu.dot_dimension_numbers<[1], [0], [0], [1], [0, 0, 1, 1], [], []>} : vector<8x8xf32>, vector<8x512xf32>, vector<8x512xf32> -> vector<8x512xf32>
    %188 = arith.addf %181, %187 : vector<8x512xf32>
    %c496_i32 = arith.constant 496 : i32
    %189 = tpu.dynamic_rotate %4 by %c496_i32 dim 1 : vector<8x512xf32>, i32 -> vector<8x512xf32>
    %cst_76 = arith.constant 0.000000e+00 : f32
    %190 = vector.broadcast %cst_76 : f32 to vector<8x512xf32>
    %191 = arith.select %129, %189, %190 : vector<8x512xi1>, vector<8x512xf32>
    %c7 = arith.constant 7 : index
    %c0_77 = arith.constant 0 : index
    %c0_78 = arith.constant 0 : index
    %192 = vector.load %arg2[%c7, %c0_77, %c0_78] : memref<9x8x8xf32, #tpu.memory_space<vmem>>, vector<1x8x8xf32>
    %193 = vector.shape_cast %192 : vector<1x8x8xf32> to vector<8x8xf32>
    %cst_79 = arith.constant dense<0.000000e+00> : vector<8x512xf32>
    %194 = tpu.matmul %193, %191, %cst_79 {dimension_numbers = #tpu.dot_dimension_numbers<[1], [0], [0], [1], [0, 0, 1, 1], [], []>} : vector<8x8xf32>, vector<8x512xf32>, vector<8x512xf32> -> vector<8x512xf32>
    %195 = arith.addf %188, %194 : vector<8x512xf32>
    %c495_i32 = arith.constant 495 : i32
    %196 = tpu.dynamic_rotate %4 by %c495_i32 dim 1 : vector<8x512xf32>, i32 -> vector<8x512xf32>
    %cst_80 = arith.constant 0.000000e+00 : f32
    %197 = vector.broadcast %cst_80 : f32 to vector<8x512xf32>
    %198 = arith.select %143, %196, %197 : vector<8x512xi1>, vector<8x512xf32>
    %c8 = arith.constant 8 : index
    %c0_81 = arith.constant 0 : index
    %c0_82 = arith.constant 0 : index
    %199 = vector.load %arg2[%c8, %c0_81, %c0_82] : memref<9x8x8xf32, #tpu.memory_space<vmem>>, vector<1x8x8xf32>
    %200 = vector.shape_cast %199 : vector<1x8x8xf32> to vector<8x8xf32>
    %cst_83 = arith.constant dense<0.000000e+00> : vector<8x512xf32>
    %201 = tpu.matmul %200, %198, %cst_83 {dimension_numbers = #tpu.dot_dimension_numbers<[1], [0], [0], [1], [0, 0, 1, 1], [], []>} : vector<8x8xf32>, vector<8x512xf32>, vector<8x512xf32> -> vector<8x512xf32>
    %202 = arith.addf %195, %201 : vector<8x512xf32>
    %c0_84 = arith.constant 0 : index
    %c0_85 = arith.constant 0 : index
    %203 = vector.load %arg3[%c0_84, %c0_85] : memref<8x1xf32, #tpu.memory_space<vmem>>, vector<8x1xf32>
    %204 = vector.broadcast %203 : vector<8x1xf32> to vector<8x512xf32>
    %205 = arith.addf %202, %204 : vector<8x512xf32>
    %cst_86 = arith.constant 0.000000e+00 : f32
    %206 = vector.broadcast %cst_86 : f32 to vector<8x512xf32>
    %207 = arith.maximumf %205, %206 : vector<8x512xf32>
    %c4_87 = arith.constant 4 : index
    %c0_88 = arith.constant 0 : index
    %c0_89 = arith.constant 0 : index
    %208 = vector.load %arg4[%c4_87, %c0_88, %c0_89] : memref<9x8x8xf32, #tpu.memory_space<vmem>>, vector<1x8x8xf32>
    %209 = vector.shape_cast %208 : vector<1x8x8xf32> to vector<8x8xf32>
    %cst_90 = arith.constant dense<0.000000e+00> : vector<8x512xf32>
    %210 = tpu.matmul %209, %207, %cst_90 {dimension_numbers = #tpu.dot_dimension_numbers<[1], [0], [0], [1], [0, 0, 1, 1], [], []>} : vector<8x8xf32>, vector<8x512xf32>, vector<8x512xf32> -> vector<8x512xf32>
    %c17_i32_91 = arith.constant 17 : i32
    %211 = tpu.dynamic_rotate %207 by %c17_i32_91 dim 1 : vector<8x512xf32>, i32 -> vector<8x512xf32>
    %cst_92 = arith.constant 0.000000e+00 : f32
    %212 = vector.broadcast %cst_92 : f32 to vector<8x512xf32>
    %213 = arith.select %51, %211, %212 : vector<8x512xi1>, vector<8x512xf32>
    %c0_93 = arith.constant 0 : index
    %c0_94 = arith.constant 0 : index
    %c0_95 = arith.constant 0 : index
    %214 = vector.load %arg4[%c0_93, %c0_94, %c0_95] : memref<9x8x8xf32, #tpu.memory_space<vmem>>, vector<1x8x8xf32>
    %215 = vector.shape_cast %214 : vector<1x8x8xf32> to vector<8x8xf32>
    %cst_96 = arith.constant dense<0.000000e+00> : vector<8x512xf32>
    %216 = tpu.matmul %215, %213, %cst_96 {dimension_numbers = #tpu.dot_dimension_numbers<[1], [0], [0], [1], [0, 0, 1, 1], [], []>} : vector<8x8xf32>, vector<8x512xf32>, vector<8x512xf32> -> vector<8x512xf32>
    %217 = arith.addf %210, %216 : vector<8x512xf32>
    %c16_i32_97 = arith.constant 16 : i32
    %218 = tpu.dynamic_rotate %207 by %c16_i32_97 dim 1 : vector<8x512xf32>, i32 -> vector<8x512xf32>
    %cst_98 = arith.constant 0.000000e+00 : f32
    %219 = vector.broadcast %cst_98 : f32 to vector<8x512xf32>
    %220 = arith.select %62, %218, %219 : vector<8x512xi1>, vector<8x512xf32>
    %c1_99 = arith.constant 1 : index
    %c0_100 = arith.constant 0 : index
    %c0_101 = arith.constant 0 : index
    %221 = vector.load %arg4[%c1_99, %c0_100, %c0_101] : memref<9x8x8xf32, #tpu.memory_space<vmem>>, vector<1x8x8xf32>
    %222 = vector.shape_cast %221 : vector<1x8x8xf32> to vector<8x8xf32>
    %cst_102 = arith.constant dense<0.000000e+00> : vector<8x512xf32>
    %223 = tpu.matmul %222, %220, %cst_102 {dimension_numbers = #tpu.dot_dimension_numbers<[1], [0], [0], [1], [0, 0, 1, 1], [], []>} : vector<8x8xf32>, vector<8x512xf32>, vector<8x512xf32> -> vector<8x512xf32>
    %224 = arith.addf %217, %223 : vector<8x512xf32>
    %c15_i32_103 = arith.constant 15 : i32
    %225 = tpu.dynamic_rotate %207 by %c15_i32_103 dim 1 : vector<8x512xf32>, i32 -> vector<8x512xf32>
    %cst_104 = arith.constant 0.000000e+00 : f32
    %226 = vector.broadcast %cst_104 : f32 to vector<8x512xf32>
    %227 = arith.select %76, %225, %226 : vector<8x512xi1>, vector<8x512xf32>
    %c2_105 = arith.constant 2 : index
    %c0_106 = arith.constant 0 : index
    %c0_107 = arith.constant 0 : index
    %228 = vector.load %arg4[%c2_105, %c0_106, %c0_107] : memref<9x8x8xf32, #tpu.memory_space<vmem>>, vector<1x8x8xf32>
    %229 = vector.shape_cast %228 : vector<1x8x8xf32> to vector<8x8xf32>
    %cst_108 = arith.constant dense<0.000000e+00> : vector<8x512xf32>
    %230 = tpu.matmul %229, %227, %cst_108 {dimension_numbers = #tpu.dot_dimension_numbers<[1], [0], [0], [1], [0, 0, 1, 1], [], []>} : vector<8x8xf32>, vector<8x512xf32>, vector<8x512xf32> -> vector<8x512xf32>
    %231 = arith.addf %224, %230 : vector<8x512xf32>
    %c1_i32_109 = arith.constant 1 : i32
    %232 = tpu.dynamic_rotate %207 by %c1_i32_109 dim 1 : vector<8x512xf32>, i32 -> vector<8x512xf32>
    %cst_110 = arith.constant 0.000000e+00 : f32
    %233 = vector.broadcast %cst_110 : f32 to vector<8x512xf32>
    %234 = arith.select %90, %232, %233 : vector<8x512xi1>, vector<8x512xf32>
    %c3_111 = arith.constant 3 : index
    %c0_112 = arith.constant 0 : index
    %c0_113 = arith.constant 0 : index
    %235 = vector.load %arg4[%c3_111, %c0_112, %c0_113] : memref<9x8x8xf32, #tpu.memory_space<vmem>>, vector<1x8x8xf32>
    %236 = vector.shape_cast %235 : vector<1x8x8xf32> to vector<8x8xf32>
    %cst_114 = arith.constant dense<0.000000e+00> : vector<8x512xf32>
    %237 = tpu.matmul %236, %234, %cst_114 {dimension_numbers = #tpu.dot_dimension_numbers<[1], [0], [0], [1], [0, 0, 1, 1], [], []>} : vector<8x8xf32>, vector<8x512xf32>, vector<8x512xf32> -> vector<8x512xf32>
    %238 = arith.addf %231, %237 : vector<8x512xf32>
    %c511_i32_115 = arith.constant 511 : i32
    %239 = tpu.dynamic_rotate %207 by %c511_i32_115 dim 1 : vector<8x512xf32>, i32 -> vector<8x512xf32>
    %cst_116 = arith.constant 0.000000e+00 : f32
    %240 = vector.broadcast %cst_116 : f32 to vector<8x512xf32>
    %241 = arith.select %104, %239, %240 : vector<8x512xi1>, vector<8x512xf32>
    %c5_117 = arith.constant 5 : index
    %c0_118 = arith.constant 0 : index
    %c0_119 = arith.constant 0 : index
    %242 = vector.load %arg4[%c5_117, %c0_118, %c0_119] : memref<9x8x8xf32, #tpu.memory_space<vmem>>, vector<1x8x8xf32>
    %243 = vector.shape_cast %242 : vector<1x8x8xf32> to vector<8x8xf32>
    %cst_120 = arith.constant dense<0.000000e+00> : vector<8x512xf32>
    %244 = tpu.matmul %243, %241, %cst_120 {dimension_numbers = #tpu.dot_dimension_numbers<[1], [0], [0], [1], [0, 0, 1, 1], [], []>} : vector<8x8xf32>, vector<8x512xf32>, vector<8x512xf32> -> vector<8x512xf32>
    %245 = arith.addf %238, %244 : vector<8x512xf32>
    %c497_i32_121 = arith.constant 497 : i32
    %246 = tpu.dynamic_rotate %207 by %c497_i32_121 dim 1 : vector<8x512xf32>, i32 -> vector<8x512xf32>
    %cst_122 = arith.constant 0.000000e+00 : f32
    %247 = vector.broadcast %cst_122 : f32 to vector<8x512xf32>
    %248 = arith.select %118, %246, %247 : vector<8x512xi1>, vector<8x512xf32>
    %c6_123 = arith.constant 6 : index
    %c0_124 = arith.constant 0 : index
    %c0_125 = arith.constant 0 : index
    %249 = vector.load %arg4[%c6_123, %c0_124, %c0_125] : memref<9x8x8xf32, #tpu.memory_space<vmem>>, vector<1x8x8xf32>
    %250 = vector.shape_cast %249 : vector<1x8x8xf32> to vector<8x8xf32>
    %cst_126 = arith.constant dense<0.000000e+00> : vector<8x512xf32>
    %251 = tpu.matmul %250, %248, %cst_126 {dimension_numbers = #tpu.dot_dimension_numbers<[1], [0], [0], [1], [0, 0, 1, 1], [], []>} : vector<8x8xf32>, vector<8x512xf32>, vector<8x512xf32> -> vector<8x512xf32>
    %252 = arith.addf %245, %251 : vector<8x512xf32>
    %c496_i32_127 = arith.constant 496 : i32
    %253 = tpu.dynamic_rotate %207 by %c496_i32_127 dim 1 : vector<8x512xf32>, i32 -> vector<8x512xf32>
    %cst_128 = arith.constant 0.000000e+00 : f32
    %254 = vector.broadcast %cst_128 : f32 to vector<8x512xf32>
    %255 = arith.select %129, %253, %254 : vector<8x512xi1>, vector<8x512xf32>
    %c7_129 = arith.constant 7 : index
    %c0_130 = arith.constant 0 : index
    %c0_131 = arith.constant 0 : index
    %256 = vector.load %arg4[%c7_129, %c0_130, %c0_131] : memref<9x8x8xf32, #tpu.memory_space<vmem>>, vector<1x8x8xf32>
    %257 = vector.shape_cast %256 : vector<1x8x8xf32> to vector<8x8xf32>
    %cst_132 = arith.constant dense<0.000000e+00> : vector<8x512xf32>
    %258 = tpu.matmul %257, %255, %cst_132 {dimension_numbers = #tpu.dot_dimension_numbers<[1], [0], [0], [1], [0, 0, 1, 1], [], []>} : vector<8x8xf32>, vector<8x512xf32>, vector<8x512xf32> -> vector<8x512xf32>
    %259 = arith.addf %252, %258 : vector<8x512xf32>
    %c495_i32_133 = arith.constant 495 : i32
    %260 = tpu.dynamic_rotate %207 by %c495_i32_133 dim 1 : vector<8x512xf32>, i32 -> vector<8x512xf32>
    %cst_134 = arith.constant 0.000000e+00 : f32
    %261 = vector.broadcast %cst_134 : f32 to vector<8x512xf32>
    %262 = arith.select %143, %260, %261 : vector<8x512xi1>, vector<8x512xf32>
    %c8_135 = arith.constant 8 : index
    %c0_136 = arith.constant 0 : index
    %c0_137 = arith.constant 0 : index
    %263 = vector.load %arg4[%c8_135, %c0_136, %c0_137] : memref<9x8x8xf32, #tpu.memory_space<vmem>>, vector<1x8x8xf32>
    %264 = vector.shape_cast %263 : vector<1x8x8xf32> to vector<8x8xf32>
    %cst_138 = arith.constant dense<0.000000e+00> : vector<8x512xf32>
    %265 = tpu.matmul %264, %262, %cst_138 {dimension_numbers = #tpu.dot_dimension_numbers<[1], [0], [0], [1], [0, 0, 1, 1], [], []>} : vector<8x8xf32>, vector<8x512xf32>, vector<8x512xf32> -> vector<8x512xf32>
    %266 = arith.addf %259, %265 : vector<8x512xf32>
    %c0_139 = arith.constant 0 : index
    %c0_140 = arith.constant 0 : index
    %267 = vector.load %arg5[%c0_139, %c0_140] : memref<8x1xf32, #tpu.memory_space<vmem>>, vector<8x1xf32>
    %268 = vector.broadcast %267 : vector<8x1xf32> to vector<8x512xf32>
    %269 = arith.addf %266, %268 : vector<8x512xf32>
    %270 = arith.addf %269, %4 : vector<8x512xf32>
    %271 = vector.extract_strided_slice %270 {offsets = [0, 0], sizes = [8, 256], strides = [1, 1]} : vector<8x512xf32> to vector<8x256xf32>
    %c0_141 = arith.constant 0 : index
    %c0_142 = arith.constant 0 : index
    %c0_143 = arith.constant 0 : index
    %272 = vector.load %arg6[%c0_141, %c0_142, %c0_143] : memref<2x8x256xf32, #tpu.memory_space<vmem>>, vector<1x8x256xf32>
    %273 = vector.shape_cast %272 : vector<1x8x256xf32> to vector<8x256xf32>
    %274 = vector.shape_cast %271 : vector<8x256xf32> to vector<1x8x256xf32>
    tpu.vector_store %arg6[%c0_141, %c0_142, %c0_143], %274 {strides = array<i32>} : memref<2x8x256xf32, #tpu.memory_space<vmem>>, vector<1x8x256xf32>,
    %275 = vector.extract_strided_slice %270 {offsets = [0, 256], sizes = [8, 256], strides = [1, 1]} : vector<8x512xf32> to vector<8x256xf32>
    %c1_144 = arith.constant 1 : index
    %c0_145 = arith.constant 0 : index
    %c0_146 = arith.constant 0 : index
    %276 = vector.load %arg6[%c1_144, %c0_145, %c0_146] : memref<2x8x256xf32, #tpu.memory_space<vmem>>, vector<1x8x256xf32>
    %277 = vector.shape_cast %276 : vector<1x8x256xf32> to vector<8x256xf32>
    %278 = vector.shape_cast %275 : vector<8x256xf32> to vector<1x8x256xf32>
    tpu.vector_store %arg6[%c1_144, %c0_145, %c0_146], %278 {strides = array<i32>} : memref<2x8x256xf32, #tpu.memory_space<vmem>>, vector<1x8x256xf32>,
    return
  }
  func.func @transform_0(%arg0: i32) -> (i32, i32, i32) {
    %c0_i32 = arith.constant 0 : i32
    %c0_i32_0 = arith.constant 0 : i32
    %c0_i32_1 = arith.constant 0 : i32
    return %arg0, %c0_i32, %c0_i32_0 : i32, i32, i32
  }
  func.func @transform_1(%arg0: i32) -> (i32, i32, i32) {
    %c0_i32 = arith.constant 0 : i32
    %c0_i32_0 = arith.constant 0 : i32
    %c0_i32_1 = arith.constant 0 : i32
    %c0_i32_2 = arith.constant 0 : i32
    return %c0_i32, %c0_i32_0, %c0_i32_1 : i32, i32, i32
  }
  func.func @transform_2(%arg0: i32) -> (i32, i32) {
    %c0_i32 = arith.constant 0 : i32
    %c0_i32_0 = arith.constant 0 : i32
    %c0_i32_1 = arith.constant 0 : i32
    return %c0_i32, %c0_i32_0 : i32, i32
  }
  func.func @transform_3(%arg0: i32) -> (i32, i32, i32) {
    %c0_i32 = arith.constant 0 : i32
    %c0_i32_0 = arith.constant 0 : i32
    %c0_i32_1 = arith.constant 0 : i32
    %c0_i32_2 = arith.constant 0 : i32
    return %c0_i32, %c0_i32_0, %c0_i32_1 : i32, i32, i32
  }
  func.func @transform_4(%arg0: i32) -> (i32, i32) {
    %c0_i32 = arith.constant 0 : i32
    %c0_i32_0 = arith.constant 0 : i32
    %c0_i32_1 = arith.constant 0 : i32
    return %c0_i32, %c0_i32_0 : i32, i32
  }
  func.func @transform_5(%arg0: i32) -> (i32, i32, i32) {
    %c0_i32 = arith.constant 0 : i32
    %c0_i32_0 = arith.constant 0 : i32
    %c0_i32_1 = arith.constant 0 : i32
    return %arg0, %c0_i32, %c0_i32_0 : i32, i32, i32
  }
}

</mosaic_0001>

<bundles_post_ra>
// kernel: rb_forward.1
= control target key start
LH: loop header
LB: loop body
LE: loop exit
PB: predicated region body
PF: predicated region fallthrough
CT: control target
= control target key end

     0   :  { %s3817_s18 = smov 0   ;;  %s4559_s0 = inlined_call_operand.vmem [shape: f32[8,8,256], index: 0, kind: input, shape index: {}]   ;;  %s4560_s1 = inlined_call_operand.vmem [shape: f32[9,8,8], index: 1, kind: input, shape index: {}]   ;;  %s4561_s2 = inlined_call_operand.vmem [shape: f32[8,1], index: 2, kind: input, shape index: {}]   ;;  %s4562_s3 = inlined_call_operand.vmem [shape: f32[9,8,8], index: 3, kind: input, shape index: {}]   ;;  %s4563_s4 = inlined_call_operand.vmem [shape: f32[8,1], index: 4, kind: input, shape index: {}]   ;;  %s4564_s5 = inlined_call_operand.vmem [shape: f32[8,8,256], index: 5, kind: output, shape index: {}]  }
   0x1 LB: > { %s3619_s19 = sadd.s32 4294967295, %s3775_s18   ;;  %p3623_p0 = scmp.ge.s32.totalorder %s3775_s18, 1  ;;  %s3775_s18 = sphi %s3817_s18, %s15_s18  }
   0x2   : > { %p189_p1 = scmp.lt.s32.totalorder %s3775_s18, 5 }
   0x4   : > { %p190_p2 = pnand %p3623_p0, %p189_p1 }
   0x6   : > { %193 = sbr.rel (%p190_p2) target bundleno = 779 (0x30b), region = 40 }
   0xb   : > { %s3624_s20 = sshll.u32 %s3619_s19, 1  ;;  %v4585_v0 = vmov 0.0   ;;  %s3778_s25 = smov 17   ;;  %v3785_v5 = vmov 0   ;;  %v2050_v6 = vld [vmem:[%s4561_s2] sm:$0xff]  ;;  %v238_v7 = vlaneseq  ;;  %v4591_v24 = vmov 0 }
   0xc   : > { %p220_p3 = scmp.lt.s32.totalorder %s3624_s20, 7  ;;  %651 = vmatprep.mubr.f32.mxu0 %v4585_v0  ;;  %722 = vmatprep.mubr.f32.mxu1 %v4585_v0  ;;  %s3779_s26 = smov 16   ;;  %v4593_v25 = vmov 0  ;;  %v4601_v31 = vmov 0  ;;  %vm4571_vm9 = vcmask 64512   ;;  %v582_v36 = vld [vmem:[%s4560_s1] sm:$0xff] }
   0xd   : > { %s3780_s27 = smov 15   ;;  %s3781_s28 = smov 1   ;;  %3764 = vset.pattern.permute.xlu0 %v3785_v5  ;;  %v3916_v8 = vand.u32 127, %v238_v7  ;;  %v3632_v42 = vld [vmem:[%s4560_s1 + $0x20] sm:$0xff]  ;;  %v3641_v49 = vld [vmem:[%s4560_s1 + $0x8] sm:$0xff]  ;;  %v4609_v57 = vmov 0 }
   0xe   : > { %s4709_s20 = smov (!%p220_p3, %s3624_s20), 7  ;;  %s3782_s29 = smov 127   ;;  %v4613_v61 = vmov 0  ;;  %v3646_v62 = vld [vmem:[%s4560_s1 + $0x10] sm:$0xff]  ;;  %v3707_v58 = vld [vmem:[%s4562_s3 + $0x18] sm:$0xff] }
   0xf   : > { %s3744_s21 = sshll.u32 %s4709_s20, 4  ;;  %s3783_s30 = smov 113   ;;  %v241_v9 = vadd.s32 256, %v3916_v8  ;;  %v240_v10 = vadd.s32 128, %v3916_v8  ;;  %v242_v11 = vadd.s32 384, %v3916_v8  ;;  %v3922_v12 = vand.u32 255, %v3916_v8 }
  0x10   : > { %s3835_s24 = scalar_lea.vmem %s4559_s0, %s3744_s21  ;;  %s3784_s6 = smov 112   ;;  %vm4568_vm4 = vcmp.lt.s32.totalorder %v3916_v8, 17  ;;  %vm4567_vm10 = vcmp.lt.s32.totalorder %v3916_v8, 16  ;;  %vm4569_vm13 = vcmp.lt.s32.totalorder %v3916_v8, 15 }
  0x11   : > { %v3838_v1 = vld [vmem:[%s3835_s24 + $0x10] sm:$0xff]  ;;  %v3841_v2 = vld [vmem:[%s3835_s24] sm:$0xff]  ;;  %v3848_v3 = vld [vmem:[%s3835_s24 + $0x18] sm:$0xff]  ;;  %s3786_s7 = smov 111   ;;  %v3924_v13 = vand.u32 255, %v241_v9  ;;  %v3926_v14 = vand.u32 255, %v240_v10 }
  0x12   : > { %569 = vrot.lane.b32.xlu1 %v3838_v1, %s3778_s25  ;;  %565 = vrot.lane.b32.xlu0 %v3841_v2, %s3778_s25  ;;  %v3851_v4 = vld [vmem:[%s3835_s24 + $0x8] sm:$0xff]  ;;  %v3928_v15 = vand.u32 255, %v242_v11  ;;  %v295_v16 = vand.u32 15, %v3922_v12  ;;  %v339_v17 = vadd.s32 4294967279, %v3922_v12  ;;  %v3992_v37 = vadd.s32 4294967280, %v3922_v12 }
  0x13   : > { %v309_v18 = vand.u32 15, %v3924_v13  ;;  %v341_v19 = vadd.s32 4294967279, %v3924_v13  ;;  %v302_v20 = vand.u32 15, %v3926_v14  ;;  %v3997_v40 = vadd.s32 4294967280, %v3924_v13 }
  0x14   : > { %v316_v21 = vand.u32 15, %v3928_v15  ;;  %vm343_vm0 = vcmp.ge.s32.totalorder %v339_v17, 0  ;;  %vm3938_vm1 = vcmp.gt.s32.totalorder %v295_v16, 0  ;;  %vm4566_vm11 = vcmp.ge.s32.totalorder %v3992_v37, 0 }
  0x15   : > { %v4592_v24 = vsel %vm3938_vm1, 4294967295, %v4591_v24  ;;  %vm345_vm2 = vcmp.ge.s32.totalorder %v341_v19, 0  ;;  %vm3944_vm3 = vcmp.gt.s32.totalorder %v309_v18, 0  ;;  %vm3949_vm5 = vcmp.gt.s32.totalorder %v302_v20, 0  ;;  %vm3961_vm7 = vmand %vm343_vm0, %vm3938_vm1 }
  0x16   : > { %571 = vrot.lane.b32.xlu1 %v3848_v3, %s3778_s25  ;;  %567 = vrot.lane.b32.xlu0 %v3851_v4, %s3778_s25  ;;  %v4594_v25 = vsel %vm3944_vm3, 4294967295, %v4593_v25  ;;  %vm3955_vm6 = vcmp.gt.s32.totalorder %v316_v21, 0  ;;  %vm3967_vm8 = vmand %vm345_vm2, %vm3944_vm3  ;;  %vm4565_vm12 = vcmp.ge.s32.totalorder %v3997_v40, 0  ;;  %v395_v45 = vadd.s32 4294967281, %v3922_v12 }
  0x17   : > { %v4602_v31 = vsel %vm3967_vm8, 4294967295, %v4601_v31  ;;  %v397_v50 = vadd.s32 4294967281, %v3924_v13  ;;  %vm4031_vm14 = vcmp.lt.s32.totalorder %v302_v20, 15  ;;  %vm4038_vm15 = vcmp.lt.s32.totalorder %v295_v16, 15  ;;  %v3653_v16 = vld [vmem:[%s4560_s1 + $0x18] sm:$0xff] }
  0x18   : > { %vm399_vm0 = vcmp.ge.s32.totalorder %v395_v45, 0  ;;  %vm4045_vm2 = vcmp.lt.s32.totalorder %v309_v18, 15  ;;  %v427_v63 = vadd.s32 4294967295, %v3922_v12  ;;  %v456_v7 = vadd.s32 1, %v3926_v14 }
  0x19   : > { %v4615_v10 = vmov 0  ;;  %v458_v17 = vadd.s32 1, %v3928_v15 }
  0x1a   : > { %876 = vrot.lane.b32.xlu1 %v3851_v4, %s3779_s26  ;;  %874 = vrot.lane.b32.xlu0 %v3841_v2, %s3779_s26 }
  0x1e   : > { %880 = vrot.lane.b32.xlu1 %v3848_v3, %s3779_s26  ;;  %878 = vrot.lane.b32.xlu0 %v3838_v1, %s3779_s26 }
  0x22   : > { %1044 = vrot.lane.b32.xlu1 %v3851_v4, %s3780_s27  ;;  %1042 = vrot.lane.b32.xlu0 %v3841_v2, %s3780_s27 }
  0x26   : > { %1048 = vrot.lane.b32.xlu1 %v3848_v3, %s3780_s27  ;;  %1046 = vrot.lane.b32.xlu0 %v3838_v1, %s3780_s27 }
  0x2a   : > { %1212 = vrot.lane.b32.xlu1 %v3851_v4, %s3781_s28  ;;  %1210 = vrot.lane.b32.xlu0 %v3841_v2, %s3781_s28 }
  0x2e   : > { %1216 = vrot.lane.b32.xlu1 %v3848_v3, %s3781_s28  ;;  %1214 = vrot.lane.b32.xlu0 %v3838_v1, %s3781_s28 }
  0x32   : > { %1382 = vrot.lane.b32.xlu1 %v3838_v1, %s3782_s29  ;;  %1380 = vrot.lane.b32.xlu0 %v3851_v4, %s3782_s29 }
  0x36   : > { %1384 = vrot.lane.b32.xlu1 %v3848_v3, %s3782_s29  ;;  %1378 = vrot.lane.b32.xlu0 %v3841_v2, %s3782_s29 }
  0x3a   : > { %1550 = vrot.lane.b32.xlu1 %v3838_v1, %s3783_s30  ;;  %1548 = vrot.lane.b32.xlu0 %v3851_v4, %s3783_s30 }
  0x3e   : > { %1552 = vrot.lane.b32.xlu1 %v3848_v3, %s3783_s30  ;;  %1546 = vrot.lane.b32.xlu0 %v3841_v2, %s3783_s30 }
  0x42   : > { %1718 = vrot.lane.b32.xlu1 %v3838_v1, %s3784_s6  ;;  %1716 = vrot.lane.b32.xlu0 %v3851_v4, %s3784_s6 }
  0x46   : > { %1720 = vrot.lane.b32.xlu1 %v3848_v3, %s3784_s6  ;;  %1714 = vrot.lane.b32.xlu0 %v3841_v2, %s3784_s6 }
  0x4a   : > { %1886 = vrot.lane.b32.xlu1 %v3838_v1, %s3786_s7  ;;  %1884 = vrot.lane.b32.xlu0 %v3851_v4, %s3786_s7 }
  0x4e   : > { %1888 = vrot.lane.b32.xlu1 %v3848_v3, %s3786_s7  ;;  %1882 = vrot.lane.b32.xlu0 %v3841_v2, %s3786_s7 }
  0x52   : > { %2053 = vperm.xlu0 %3764, %v2050_v6  }
  0x84   : > { %v570_v22 = vpop.permute.xlu1 %569  ;;  %v566_v23 = vpop.permute.xlu0 %565 }
  0x88   : > { %v572_v29 = vpop.permute.xlu1 %571  ;;  %v568_v30 = vpop.permute.xlu0 %567 }
  0x89   : > { %v576_v32 = vsel %vm4568_vm4, %v566_v23, %v568_v30  ;;  %v574_v33 = vsel %vm4568_vm4, %v570_v22, %v572_v29  ;;  %v577_v34 = vsel %vm4568_vm4, %v572_v29, %v566_v23  ;;  %v575_v35 = vsel %vm4568_vm4, %v568_v30, %v570_v22 }
  0x8a   : > { %3633 = vmatprep.subr.msk.mxu0 %vm3949_vm5, %v576_v32  ;;  %3636 = vmatprep.subr.msk.mxu1 %vm3955_vm6, %v574_v33  ;;  %v484_v29 = vadd.s32 15, %v3926_v14  ;;  %v4626_v32 = vmov 0 }
  0x8b   : > { %3634 = vmatpush1.msk.msra.mxu0 %vm3961_vm7, %v577_v34  ;;  %3637 = vmatpush1.msk.msra.mxu1 %vm3967_vm8, %v575_v35  ;;  %v3660_v35 = vld [vmem:[%s4560_s1 + $0x28] sm:$0xff] }
  0x8c   : > { %v877_v38 = vpop.permute.xlu1 %876  ;;  %762 = vmatprep.subr.mxu0 %v3851_v4  ;;  %v875_v39 = vpop.permute.xlu0 %874  ;;  %3635 = vmatmul.mubr.msk.f32.vlgmr.msra.gmra.mxu0 %vm4571_vm9, %v582_v36  ;;  %v429_v4 = vadd.s32 4294967295, %v3924_v13 }
  0x8d   : > { %763 = vmatpush1.msra.mxu0 %v3841_v2  ;;  %v885_v41 = vsel %vm4567_vm10, %v875_v39, %v877_v38  ;;  %3638 = vmatmul.mubr.msk.f32.vlgmr.msra.gmra.mxu1 %vm4571_vm9, %v582_v36  ;;  %v486_v36 = vadd.s32 15, %v3928_v15 }
  0x8e   : > { %926 = vmatprep.subr.mxu0 %v885_v41  ;;  %833 = vmatprep.subr.mxu1 %v3848_v3 }
  0x8f   : > { %796 = vmatprep.mubr.f32.mxu0 %v4585_v0  ;;  %834 = vmatpush1.msra.mxu1 %v3838_v1 }
  0x90   : > { %v881_v43 = vpop.permute.xlu1 %880  ;;  %v879_v44 = vpop.permute.xlu0 %878  ;;  %3639 = vmatmul.mubr.msk.f32.vlgmr.msra.gmra.mxu0 %vm4571_vm9, %v3632_v42  ;;  %867 = vmatprep.mubr.f32.mxu1 %v4585_v0 }
  0x91   : > { %v886_v46 = vsel %vm4567_vm10, %v881_v43, %v875_v39  ;;  %v884_v47 = vsel %vm4567_vm10, %v877_v38, %v879_v44  ;;  %v883_v48 = vsel %vm4567_vm10, %v879_v44, %v881_v43  ;;  %3640 = vmatmul.mubr.msk.f32.vlgmr.msra.gmra.mxu1 %vm4571_vm9, %v3632_v42  ;;  %960 = vmatprep.mubr.f32.mxu0 %v4585_v0  ;;  %vm4064_vm10 = vcmp.lt.s32.totalorder %v316_v21, 15  ;;  %v3721_v42 = vld [vmem:[%s4562_s3 + $0x30] sm:$0xff] }
  0x92   : > { %3642 = vmatpush1.msk.msra.mxu0 %vm4566_vm11, %v886_v46  ;;  %997 = vmatprep.subr.mxu1 %v883_v48  ;;  %vm4058_vm11 = vmand %vm399_vm0, %vm4038_vm15  ;;  %vm431_vm0 = vcmp.ge.s32.totalorder %v427_v63, 0  ;;  %v4622_v21 = vmov 0  ;;  %v4631_v46 = vmov 0  ;;  %v536_v63 = vadd.s32 17, %v3926_v14 }
  0x93   : > { %3644 = vmatpush1.msk.msra.mxu1 %vm4565_vm12, %v884_v47  ;;  %1031 = vmatprep.mubr.f32.mxu1 %v4585_v0  ;;  %vm401_vm12 = vcmp.ge.s32.totalorder %v397_v50, 0  ;;  %v4610_v57 = vsel %vm4058_vm11, 4294967295, %v4609_v57  ;;  %v4189_v47 = vadd.s32 16, %v3926_v14  ;;  %v3667_v50 = vld [vmem:[%s4560_s1 + $0x30] sm:$0xff] }
  0x94   : > { %v1045_v53 = vpop.permute.xlu1 %1044  ;;  %v1043_v54 = vpop.permute.xlu0 %1042  ;;  %3643 = vmatmul.mubr.msk.f32.vlgmr.msra.gmra.mxu0 %vm4571_vm9, %v3641_v49  ;;  %vm4070_vm4 = vmand %vm401_vm12, %vm4045_vm2  ;;  %vm4572_vm12 = vcmp.lt.s32.totalorder %v3916_v8, 1 }
  0x95   : > { %v1053_v56 = vsel %vm4569_vm13, %v1043_v54, %v1045_v53  ;;  %3645 = vmatmul.mubr.msk.f32.vlgmr.msra.gmra.mxu1 %vm4571_vm9, %v3641_v49  ;;  %1128 = vmatprep.mubr.f32.mxu0 %v4585_v0  ;;  %v4614_v61 = vsel %vm4070_vm4, 4294967295, %v4613_v61 }
  0x96   : > { %3647 = vmatprep.subr.msk.mxu0 %vm4031_vm14, %v1053_v56  ;;  %1199 = vmatprep.mubr.f32.mxu1 %v4585_v0 }
  0x98   : > { %v1049_v59 = vpop.permute.xlu1 %1048  ;;  %v1047_v60 = vpop.permute.xlu0 %1046 }
  0x99   : > { %v1054_v1 = vsel %vm4569_vm13, %v1049_v59, %v1043_v54  ;;  %v1051_v2 = vsel %vm4569_vm13, %v1047_v60, %v1049_v59  ;;  %v1052_v3 = vsel %vm4569_vm13, %v1045_v53, %v1047_v60  ;;  %vm433_vm13 = vcmp.ge.s32.totalorder %v429_v4, 0  ;;  %v3674_v4 = vld [vmem:[%s4560_s1 + $0x38] sm:$0xff] }
  0x9a   : > { %3648 = vmatpush1.msk.msra.mxu0 %vm4058_vm11, %v1054_v1  ;;  %3650 = vmatprep.subr.msk.mxu1 %vm4064_vm10, %v1051_v2  ;;  %v4210_v59 = vadd.s32 16, %v3928_v15 }
  0x9b   : > { %3651 = vmatpush1.msk.msra.mxu1 %vm4070_vm4, %v1052_v3  ;;  %3649 = vmatmul.mubr.msk.f32.vlgmr.msra.gmra.mxu0 %vm4571_vm9, %v3646_v62  ;;  %vm4103_vm4 = vmand %vm431_vm0, %vm3938_vm1  ;;  %vm4619_vm0 = vcmp.lt.s32.totalorder %v3916_v8, 1 }
  0x9c   : > { %v1213_v5 = vpop.permute.xlu1 %1212  ;;  %v1211_v6 = vpop.permute.xlu0 %1210  ;;  %3652 = vmatmul.mubr.msk.f32.vlgmr.msra.gmra.mxu1 %vm4571_vm9, %v3646_v62  ;;  %1296 = vmatprep.mubr.f32.mxu0 %v4585_v0  ;;  %v4616_v10 = vsel %vm4103_vm4, 4294967295, %v4615_v10  ;;  %vm4109_vm9 = vmand %vm433_vm13, %vm3944_vm3  ;;  %vm4577_vm13 = vcmp.lt.s32.totalorder %v3916_v8, 127  ;;  %4634 = vst [vmem:[#allocation2_spill] sm:$0xff] %v4210_v59 }
  0x9d   : > { %v1221_v9 = vsel %vm4572_vm12, %v1211_v6, %v1213_v5  ;;  %1367 = vmatprep.mubr.f32.mxu1 %v4585_v0  ;;  %vm464_vm12 = vcmp.lt.s32.totalorder %v456_v7, 256  ;;  %vm4620_vm11 = vmmov %vm4619_vm0 }
  0x9e   : > { %3654 = vmatprep.subr.msk.mxu0 %vm3949_vm5, %v1221_v9  ;;  %vm4621_vm8 = vmmov %vm4619_vm0 }
  0xa0   : > { %v1217_v11 = vpop.permute.xlu1 %1216  ;;  %v1215_v12 = vpop.permute.xlu0 %1214 }
  0xa1   : > { %v1222_v18 = vsel %vm4619_vm0, %v1217_v11, %v1211_v6  ;;  %v1219_v19 = vsel %vm4620_vm11, %v1215_v12, %v1217_v11  ;;  %v1220_v20 = vsel %vm4621_vm8, %v1213_v5, %v1215_v12  ;;  %vm4132_vm0 = vmand %vm464_vm12, %vm4031_vm14  ;;  %vm4624_vm11 = vcmask 64512  }
  0xa2   : > { %3655 = vmatpush1.msk.msra.mxu0 %vm4103_vm4, %v1222_v18  ;;  %3657 = vmatprep.subr.msk.mxu1 %vm3955_vm6, %v1219_v19  ;;  %v4623_v21 = vsel %vm4132_vm0, 4294967295, %v4622_v21  ;;  %vm4625_vm8 = vmmov %vm4624_vm11  ;;  %vm466_vm4 = vcmp.lt.s32.totalorder %v458_v17, 256  ;;  %v538_v5 = vadd.s32 17, %v3928_v15  ;;  %v3679_v19 = vld [vmem:[%s4560_s1 + $0x40] sm:$0xff] }
  0xa3   : > { %3658 = vmatpush1.msk.msra.mxu1 %vm4109_vm9, %v1220_v20  ;;  %3656 = vmatmul.mubr.msk.f32.vlgmr.msra.gmra.mxu0 %vm4624_vm11, %v3653_v16  ;;  %vm4147_vm12 = vmand %vm466_vm4, %vm4064_vm10  ;;  %vm492_vm11 = vcmp.lt.s32.totalorder %v484_v29, 256  ;;  %vm4579_vm4 = vcmp.lt.s32.totalorder %v3916_v8, 113 }
  0xa4   : > { %v1383_v22 = vpop.permute.xlu1 %1382  ;;  %v1381_v23 = vpop.permute.xlu0 %1380  ;;  %3659 = vmatmul.mubr.msk.f32.vlgmr.msra.gmra.mxu1 %vm4625_vm8, %v3653_v16  ;;  %1464 = vmatprep.mubr.f32.mxu0 %v4585_v0  ;;  %v4627_v32 = vsel %vm4147_vm12, 4294967295, %v4626_v32  ;;  %v4640_v16 = vmov 0 }
  0xa5   : > { %v1388_v30 = vsel %vm4577_vm13, %v1381_v23, %v1383_v22  ;;  %1535 = vmatprep.mubr.f32.mxu1 %v4585_v0 }
  0xa6   : > { %3661 = vmatprep.subr.msk.mxu0 %vm4132_vm0, %v1388_v30  ;;  %vm4171_vm0 = vmand %vm492_vm11, %vm3949_vm5 }
  0xa8   : > { %v1385_v33 = vpop.permute.xlu1 %1384  ;;  %v1379_v34 = vpop.permute.xlu0 %1378 }
  0xa9   : > { %v1387_v38 = vsel %vm4577_vm13, %v1383_v22, %v1385_v33  ;;  %v1389_v39 = vsel %vm4577_vm13, %v1379_v34, %v1381_v23  ;;  %v1390_v41 = vsel %vm4577_vm13, %v1385_v33, %v1379_v34  ;;  %vm4630_vm13 = vmmov %vm4625_vm8 }
  0xaa   : > { %3662 = vmatpush1.msk.msra.mxu0 %vm4038_vm15, %v1389_v39  ;;  %3664 = vmatprep.subr.msk.mxu1 %vm4147_vm12, %v1390_v41  ;;  %vm494_vm12 = vcmp.lt.s32.totalorder %v486_v36, 256 }
  0xab   : > { %3663 = vmatmul.mubr.msk.f32.vlgmr.msra.gmra.mxu0 %vm4625_vm8, %v3660_v35  ;;  %3665 = vmatpush1.msk.msra.mxu1 %vm4045_vm2, %v1387_v38  ;;  %vm4184_vm11 = vmand %vm494_vm12, %vm3955_vm6 }
  0xac   : > { %v1551_v43 = vpop.permute.xlu1 %1550  ;;  %v1549_v44 = vpop.permute.xlu0 %1548  ;;  %3666 = vmatmul.mubr.msk.f32.vlgmr.msra.gmra.mxu1 %vm4630_vm13, %v3660_v35  ;;  %1632 = vmatprep.mubr.f32.mxu0 %v4585_v0  ;;  %v4632_v46 = vsel %vm4184_vm11, 4294967295, %v4631_v46  ;;  %vm4584_vm13 = vcmp.lt.s32.totalorder %v3916_v8, 112  ;;  %vm4633_vm12 = vmmov %vm4625_vm8  ;;  %vm4580_vm8 = vcmp.lt.s32.totalorder %v4189_v47, 256 }
  0xad   : > { %v1556_v45 = vsel %vm4579_vm4, %v1549_v44, %v1551_v43  ;;  %1703 = vmatprep.mubr.f32.mxu1 %v4585_v0 }
  0xae   : > { %3668 = vmatprep.subr.msk.mxu0 %vm4171_vm0, %v1556_v45 }
  0xb0   : > { %v1553_v48 = vpop.permute.xlu1 %1552  ;;  %v1547_v49 = vpop.permute.xlu0 %1546 }
  0xb1   : > { %v1555_v53 = vsel %vm4579_vm4, %v1551_v43, %v1553_v48  ;;  %v1557_v54 = vsel %vm4579_vm4, %v1547_v49, %v1549_v44  ;;  %v1558_v56 = vsel %vm4579_vm4, %v1553_v48, %v1547_v49  ;;  %vm4635_vm4 = vmmov %vm4633_vm12 }
  0xb2   : > { %3669 = vmatpush1.msk.msra.mxu0 %vm3938_vm1, %v1557_v54  ;;  %3671 = vmatprep.subr.msk.mxu1 %vm4184_vm11, %v1558_v56 }
  0xb3   : > { %3670 = vmatmul.mubr.msk.f32.vlgmr.msra.gmra.mxu0 %vm4633_vm12, %v3667_v50  ;;  %3672 = vmatpush1.msk.msra.mxu1 %vm3944_vm3, %v1555_v53  ;;  %vm4589_vm12 = vcmp.lt.s32.totalorder %v4210_v59, 256  ;;  %vm4636_vm3 = vcmask 64512  }
  0xb4   : > { %v1719_v60 = vpop.permute.xlu1 %1718  ;;  %3673 = vmatmul.mubr.msk.f32.vlgmr.msra.gmra.mxu1 %vm4635_vm4, %v3667_v50  ;;  %v1717_v62 = vpop.permute.xlu0 %1716  ;;  %1800 = vmatprep.mubr.f32.mxu0 %v4585_v0  ;;  %vm544_vm4 = vcmp.lt.s32.totalorder %v536_v63, 256  ;;  %vm4639_vm1 = vmmov %vm4636_vm3 }
  0xb5   : > { %v1724_v1 = vsel %vm4584_vm13, %v1717_v62, %v1719_v60  ;;  %1871 = vmatprep.mubr.f32.mxu1 %v4585_v0  ;;  %vm4237_vm11 = vmand %vm544_vm4, %vm4031_vm14  ;;  %vm4644_vm4 = vcmp.lt.s32.totalorder %v3916_v8, 17 }
  0xb6   : > { %3675 = vmatprep.subr.msk.mxu0 %vm4580_vm8, %v1724_v1  ;;  %vm4590_vm8 = vcmp.lt.s32.totalorder %v3916_v8, 111 }
  0xb8   : > { %v1721_v2 = vpop.permute.xlu1 %1720  ;;  %v1715_v3 = vpop.permute.xlu0 %1714 }
  0xb9   : > { %v1723_v14 = vsel %vm4584_vm13, %v1719_v60, %v1721_v2  ;;  %v1725_v6 = vsel %vm4584_vm13, %v1715_v3, %v1717_v62  ;;  %v1726_v7 = vsel %vm4584_vm13, %v1721_v2, %v1715_v3  ;;  %vm546_vm13 = vcmp.lt.s32.totalorder %v538_v5, 256 }
  0xba   : > { %1767 = vmatpush1.msra.mxu0 %v1725_v6  ;;  %3677 = vmatprep.subr.msk.mxu1 %vm4589_vm12, %v1726_v7 }
  0xbb   : > { %3676 = vmatmul.mubr.msk.f32.vlgmr.msra.gmra.mxu0 %vm4636_vm3, %v3674_v4  ;;  %1838 = vmatpush1.msra.mxu1 %v1723_v14  ;;  %vm4250_vm3 = vmand %vm546_vm13, %vm4064_vm10 }
  0xbc   : > { %v1887_v9 = vpop.permute.xlu1 %1886  ;;  %3678 = vmatmul.mubr.msk.f32.vlgmr.msra.gmra.mxu1 %vm4639_vm1, %v3674_v4  ;;  %v1885_v11 = vpop.permute.xlu0 %1884  ;;  %1968 = vmatprep.mubr.f32.mxu0 %v4585_v0  ;;  %v4641_v16 = vsel %vm4250_vm3, 4294967295, %v4640_v16  ;;  %vm4643_vm13 = vmmov %vm4639_vm1 }
  0xbd   : > { %v1892_v12 = vsel %vm4590_vm8, %v1885_v11, %v1887_v9  ;;  %2039 = vmatprep.mubr.f32.mxu1 %v4585_v0  ;;  %4642 = vst [vmem:[#allocation3_spill] sm:$0xff] %v4641_v16 }
  0xbe   : > { %3680 = vmatprep.subr.msk.mxu0 %vm4237_vm11, %v1892_v12 }
  0xc0   : > { %v1889_v17 = vpop.permute.xlu1 %1888  ;;  %v1883_v18 = vpop.permute.xlu0 %1882 }
  0xc1   : > { %v1891_v20 = vsel %vm4590_vm8, %v1887_v9, %v1889_v17  ;;  %v1893_v22 = vsel %vm4590_vm8, %v1883_v18, %v1885_v11  ;;  %v1894_v23 = vsel %vm4590_vm8, %v1889_v17, %v1883_v18 }
  0xc2   : > { %3681 = vmatpush1.msk.msra.mxu0 %vm4038_vm15, %v1893_v22  ;;  %3683 = vmatprep.subr.msk.mxu1 %vm4250_vm3, %v1894_v23 }
  0xc3   : > { %3682 = vmatmul.mubr.msk.f32.vlgmr.msra.gmra.mxu0 %vm4639_vm1, %v3679_v19  ;;  %3684 = vmatpush1.msk.msra.mxu1 %vm4045_vm2, %v1891_v20  ;;  %vm4645_vm1 = vmmov %vm4644_vm4 }
  0xc4   : > { %3685 = vmatmul.mubr.msk.f32.vlgmr.msra.gmra.mxu1 %vm4643_vm13, %v3679_v19  ;;  %2150 = vmatprep.mubr.f32.mxu0 %v4585_v0  ;;  %vm4646_vm13 = vmmov %vm4645_vm1 }
  0xc5   : > { %2221 = vmatprep.mubr.f32.mxu1 %v4585_v0 }
 0x14c   : > { %v653_v29 = vpop.f32.mrf.mxu0 }
 0x14d   : > { %v724_v30 = vpop.f32.mrf.mxu1 }
 0x14e   : > { %v655_v33 = vpop.f32.mrf.mxu0 }
 0x14f   : > { %v726_v34 = vpop.f32.mrf.mxu1 }
 0x150   : > { %v798_v35 = vpop.f32.mrf.mxu0 }
 0x151   : > { %v869_v36 = vpop.f32.mrf.mxu1  ;;  %v799_v62 = vadd.f32 %v798_v35, %v653_v29 }
 0x152   : > { %v800_v38 = vpop.f32.mrf.mxu0  ;;  %v870_v1 = vadd.f32 %v869_v36, %v724_v30 }
 0x153   : > { %v871_v39 = vpop.f32.mrf.mxu1  ;;  %v801_v35 = vadd.f32 %v800_v38, %v655_v33 }
 0x154   : > { %v962_v41 = vpop.f32.mrf.mxu0 }
 0x155   : > { %v1033_v43 = vpop.f32.mrf.mxu1  ;;  %v1038_v3 = vadd.f32 %v962_v41, %v799_v62  ;;  %v872_v62 = vadd.f32 %v871_v39, %v726_v34 }
 0x156   : > { %v964_v44 = vpop.f32.mrf.mxu0  ;;  %v1040_v5 = vadd.f32 %v1033_v43, %v870_v1 }
 0x157   : > { %v1035_v45 = vpop.f32.mrf.mxu1 }
 0x15b   : > { %v1130_v48 = vpop.f32.mrf.mxu0 }
 0x15c   : > { %v1201_v49 = vpop.f32.mrf.mxu1  ;;  %v1206_v6 = vadd.f32 %v1130_v48, %v1038_v3 }
 0x15d   : > { %v1132_v50 = vpop.f32.mrf.mxu0  ;;  %v1208_v9 = vadd.f32 %v1201_v49, %v1040_v5  ;;  %v2054_v49 = vpop.permute.xlu0 %2053  ;;  %v1039_v5 = vadd.f32 %v964_v44, %v801_v35 }
 0x15e   : > { %v1203_v53 = vpop.f32.mrf.mxu1 }
 0x163   : > { %v1298_v54 = vpop.f32.mrf.mxu0 }
 0x164   : > { %v1369_v56 = vpop.f32.mrf.mxu1  ;;  %v1374_v17 = vadd.f32 %v1298_v54, %v1206_v6  ;;  %v1041_v6 = vadd.f32 %v1035_v45, %v872_v62 }
 0x165   : > { %v1300_v60 = vpop.f32.mrf.mxu0  ;;  %v1376_v18 = vadd.f32 %v1369_v56, %v1208_v9 }
 0x166   : > { %v1371_v63 = vpop.f32.mrf.mxu1  ;;  %v1209_v38 = vadd.f32 %v1203_v53, %v1041_v6 }
 0x168   : > { %v1377_v34 = vadd.f32 %v1371_v63, %v1209_v38  ;;  %v3686_v38 = vld [vmem:[%s4562_s3 + $0x20] sm:$0xff] }
 0x16b   : > { %v1466_v2 = vpop.f32.mrf.mxu0 }
 0x16c   : > { %v1537_v4 = vpop.f32.mrf.mxu1  ;;  %v1542_v23 = vadd.f32 %v1466_v2, %v1374_v17  ;;  %v1207_v2 = vadd.f32 %v1132_v50, %v1039_v5 }
 0x16d   : > { %v1468_v14 = vpop.f32.mrf.mxu0  ;;  %v1544_v29 = vadd.f32 %v1537_v4, %v1376_v18  ;;  %v3542_v18 = vld [vmem:[%s4563_s4] sm:$0xff] }
 0x16e   : > { %v1539_v7 = vpop.f32.mrf.mxu1 }
 0x173   : > { %v1634_v11 = vpop.f32.mrf.mxu0 }
 0x174   : > { %v1705_v12 = vpop.f32.mrf.mxu1  ;;  %v1710_v30 = vadd.f32 %v1634_v11, %v1542_v23 }
 0x175   : > { %v1636_v19 = vpop.f32.mrf.mxu0  ;;  %v1712_v36 = vadd.f32 %v1705_v12, %v1544_v29 }
 0x176   : > { %v1707_v20 = vpop.f32.mrf.mxu1 }
 0x17b   : > { %v1802_v22 = vpop.f32.mrf.mxu0 }
 0x17c   : > { %v1873_v0 = vpop.f32.mrf.mxu1  ;;  %v1878_v43 = vadd.f32 %v1802_v22, %v1710_v30 }
 0x17d   : > { %v1804_v41 = vpop.f32.mrf.mxu0  ;;  %v1880_v48 = vadd.f32 %v1873_v0, %v1712_v36  ;;  %v1375_v0 = vadd.f32 %v1300_v60, %v1207_v2 }
 0x17e   : > { %v1875_v1 = vpop.f32.mrf.mxu1 }
 0x17f   : > { %v1543_v39 = vadd.f32 %v1468_v14, %v1375_v0 }
 0x183   : > { %v1970_v3 = vpop.f32.mrf.mxu0 }
 0x184   : > { %v2046_v16 = vadd.f32 %v1970_v3, %v1878_v43  ;;  %v2041_v54 = vpop.f32.mrf.mxu1 }
 0x185   : > { %v2048_v56 = vadd.f32 %v2041_v54, %v1880_v48  ;;  %v1972_v44 = vpop.f32.mrf.mxu0 }
 0x186   : > { %v2056_v9 = vadd.f32 %v2054_v49, %v2046_v16  ;;  %v1711_v16 = vadd.f32 %v1636_v19, %v1543_v39  ;;  %v2043_v60 = vpop.f32.mrf.mxu1 }
 0x187   : > { %v2058_v59 = vadd.f32 %v2054_v49, %v2048_v56  ;;  %v2082_v56 = vld [vmem:[%s4562_s3] sm:$0xff] }
 0x188   : > { %v4273_v17 = vmax.f32 %v2056_v9, 0.0  ;;  %v1879_v45 = vadd.f32 %v1804_v41, %v1711_v16 }
 0x189   : > { %v4275_v33 = vmax.f32 %v2058_v59, 0.0  ;;  %v1545_v59 = vadd.f32 %v1539_v7, %v1377_v34 }
 0x18a   : > { %2066 = vrot.lane.b32.xlu1 %v4273_v17, %s3778_s25  ;;  %v2047_v53 = vadd.f32 %v1972_v44, %v1879_v45 }
 0x18b   : > { %2070 = vrot.lane.b32.xlu0 %v4275_v33, %s3778_s25  ;;  %v1713_v50 = vadd.f32 %v1707_v20, %v1545_v59 }
 0x18c   : > { %v2057_v4 = vadd.f32 %v2054_v49, %v2047_v53 }
 0x18d   : > { %v1881_v63 = vadd.f32 %v1875_v1, %v1713_v50 }
 0x18e   : > { %2878 = vrot.lane.b32.xlu1 %v4275_v33, %s3782_s29  ;;  %v2061_v7 = vmax.f32 %v2057_v4, 0.0 }
 0x18f   : > { %2373 = vrot.lane.b32.xlu0 %v4273_v17, %s3779_s26  ;;  %v2049_v14 = vadd.f32 %v2043_v60, %v1881_v63 }
 0x191   : > { %v2059_v11 = vadd.f32 %v2054_v49, %v2049_v14 }
 0x192   : > { %3045 = vrot.lane.b32.xlu1 %v4275_v33, %s3783_s30 }
 0x193   : > { %2377 = vrot.lane.b32.xlu0 %v4275_v33, %s3779_s26  ;;  %v2063_v12 = vmax.f32 %v2059_v11, 0.0 }
 0x196   : > { %3212 = vrot.lane.b32.xlu1 %v4275_v33, %s3784_s6 }
 0x197   : > { %2540 = vrot.lane.b32.xlu0 %v4273_v17, %s3780_s27 }
 0x19a   : > { %3379 = vrot.lane.b32.xlu1 %v4275_v33, %s3786_s7 }
 0x19b   : > { %2544 = vrot.lane.b32.xlu0 %v4275_v33, %s3780_s27 }
 0x19e   : > { %2068 = vrot.lane.b32.xlu1 %v2061_v7, %s3778_s25 }
 0x19f   : > { %2707 = vrot.lane.b32.xlu0 %v4273_v17, %s3781_s28 }
 0x1a2   : > { %2072 = vrot.lane.b32.xlu1 %v2063_v12, %s3778_s25 }
 0x1a3   : > { %2711 = vrot.lane.b32.xlu0 %v4275_v33, %s3781_s28 }
 0x1a6   : > { %2375 = vrot.lane.b32.xlu1 %v2061_v7, %s3779_s26 }
 0x1a7   : > { %2874 = vrot.lane.b32.xlu0 %v4273_v17, %s3782_s29 }
 0x1aa   : > { %2379 = vrot.lane.b32.xlu1 %v2063_v12, %s3779_s26  ;;  %s231_s26 = scalar_lea.vmem %s4564_s5, %s3744_s21 }
 0x1ab   : > { %3041 = vrot.lane.b32.xlu0 %v4273_v17, %s3783_s30 }
 0x1ae   : > { %2542 = vrot.lane.b32.xlu1 %v2061_v7, %s3780_s27 }
 0x1af   : > { %3208 = vrot.lane.b32.xlu0 %v4273_v17, %s3784_s6 }
 0x1b2   : > { %2546 = vrot.lane.b32.xlu1 %v2063_v12, %s3780_s27 }
 0x1b3   : > { %2876 = vrot.lane.b32.xlu0 %v2061_v7, %s3782_s29 }
 0x1b6   : > { %2709 = vrot.lane.b32.xlu1 %v2061_v7, %s3781_s28 }
 0x1b7   : > { %3043 = vrot.lane.b32.xlu0 %v2061_v7, %s3783_s30 }
 0x1ba   : > { %2713 = vrot.lane.b32.xlu1 %v2063_v12, %s3781_s28 }
 0x1bb   : > { %3210 = vrot.lane.b32.xlu0 %v2061_v7, %s3784_s6 }
 0x1be   : > { %2880 = vrot.lane.b32.xlu1 %v2063_v12, %s3782_s29 }
 0x1bf   : > { %3377 = vrot.lane.b32.xlu0 %v2061_v7, %s3786_s7 }
 0x1c2   : > { %3047 = vrot.lane.b32.xlu1 %v2063_v12, %s3783_s30 }
 0x1c3   : > { %3375 = vrot.lane.b32.xlu0 %v4273_v17, %s3786_s7 }
 0x1c6   : > { %3214 = vrot.lane.b32.xlu1 %v2063_v12, %s3784_s6 }
 0x1c7   : > { %3545 = vperm.xlu0 %3764, %v3542_v18  }
 0x1ca   : > { %3381 = vrot.lane.b32.xlu1 %v2063_v12, %s3786_s7 }
 0x1fc   : > { %v2067_v19 = vpop.permute.xlu1 %2066 }
 0x1fd   : > { %v2071_v20 = vpop.permute.xlu0 %2070 }
 0x200   : > { %v4328_v22 = vpop.permute.xlu1 %2878 }
 0x201   : > { %v2374_v23 = vpop.permute.xlu0 %2373 }
 0x204   : > { %v4330_v29 = vpop.permute.xlu1 %3045 }
 0x205   : > { %v2378_v35 = vpop.permute.xlu0 %2377 }
 0x208   : > { %v4332_v30 = vpop.permute.xlu1 %3212 }
 0x209   : > { %v2541_v36 = vpop.permute.xlu0 %2540 }
 0x20c   : > { %v4334_v41 = vpop.permute.xlu1 %3379 }
 0x20d   : > { %v2545_v62 = vpop.permute.xlu0 %2544 }
 0x210   : > { %v2069_v43 = vpop.permute.xlu1 %2068 }
 0x211   : > { %v2076_v1 = vsel %vm4644_vm4, %v2067_v19, %v2069_v43  ;;  %v4338_v48 = vpop.permute.xlu0 %2707  ;;  %vm4647_vm4 = vmmov %vm4645_vm1 }
 0x212   : > { %3687 = vmatprep.subr.msk.mxu0 %vm3949_vm5, %v2076_v1  ;;  %v2075_v6 = vsel %vm4647_vm4, %v2069_v43, %v2071_v20  ;;  %vm4651_vm4 = vcmp.lt.s32.totalorder %v3916_v8, 16  ;;  %v4698_v1 = vld [vmem:[#allocation2_spill] sm:$0xff] }
 0x214   : > { %v2073_v3 = vpop.permute.xlu1 %2072 }
 0x215   : > { %v2074_v49 = vsel %vm4645_vm1, %v2071_v20, %v2073_v3  ;;  %v2077_v5 = vsel %vm4646_vm13, %v2073_v3, %v2067_v19  ;;  %v4346_v54 = vpop.permute.xlu0 %2711  ;;  %vm4648_vm1 = vnez %v4602_v31  ;;  %vm4649_vm13 = vcmask 64512  }
 0x216   : > { %3688 = vmatpush1.msk.msra.mxu0 %vm3961_vm7, %v2077_v5  ;;  %3690 = vmatprep.subr.msk.mxu1 %vm3955_vm6, %v2074_v49  ;;  %vm4650_vm12 = vmmov %vm4649_vm13  ;;  %v4652_v31 = vmov 0.0  }
 0x217   : > { %3691 = vmatpush1.msk.msra.mxu1 %vm4648_vm1, %v2075_v6  ;;  %2261 = vmatprep.subr.mxu0 %v2061_v7  ;;  %vm4653_vm7 = vmmov %vm4650_vm12 }
 0x218   : > { %3689 = vmatmul.mubr.msk.f32.vlgmr.msra.gmra.mxu0 %vm4649_vm13, %v2082_v56  ;;  %2332 = vmatprep.subr.mxu1 %v2063_v12  ;;  %v2376_v9 = vpop.permute.xlu1 %2375  ;;  %vm4654_vm1 = vmmov %vm4651_vm4 }
 0x219   : > { %2262 = vmatpush1.msra.mxu0 %v4273_v17  ;;  %v4361_v2 = vpop.permute.xlu0 %2874  ;;  %3692 = vmatmul.mubr.msk.f32.vlgmr.msra.gmra.mxu1 %vm4650_vm12, %v2082_v56  ;;  %v2383_v28 = vsel %vm4651_vm4, %v2374_v23, %v2376_v9  ;;  %vm4655_vm12 = vmmov %vm4654_vm1 }
 0x21a   : > { %2333 = vmatpush1.msra.mxu1 %v4275_v33  ;;  %2424 = vmatprep.subr.mxu0 %v2383_v28  ;;  %vm4656_vm13 = vmmov %vm4653_vm7  ;;  %v3695_v33 = vld [vmem:[%s4562_s3 + $0x8] sm:$0xff] }
 0x21b   : > { %2295 = vmatprep.mubr.f32.mxu0 %v4652_v31  ;;  %2366 = vmatprep.mubr.f32.mxu1 %v4652_v31  ;;  %vm4657_vm4 = vmmov %vm4654_vm1 }
 0x21c   : > { %v2380_v0 = vpop.permute.xlu1 %2379  ;;  %3693 = vmatmul.mubr.msk.f32.vlgmr.msra.gmra.mxu0 %vm4653_vm7, %v3686_v38  ;;  %v2382_v16 = vsel %vm4657_vm4, %v2376_v9, %v2378_v35  ;;  %vm4658_vm7 = vcmp.ge.s32.totalorder %v3992_v37, 0 }
 0x21d   : > { %v2384_v17 = vsel %vm4654_vm1, %v2380_v0, %v2374_v23  ;;  %v4375_v34 = vpop.permute.xlu0 %3041  ;;  %v2381_v39 = vsel %vm4655_vm12, %v2378_v35, %v2380_v0  ;;  %3694 = vmatmul.mubr.msk.f32.vlgmr.msra.gmra.mxu1 %vm4656_vm13, %v3686_v38  ;;  %2458 = vmatprep.mubr.f32.mxu0 %v4652_v31  ;;  %vm4659_vm1 = vcmp.ge.s32.totalorder %v3997_v40, 0  ;;  %vm4660_vm12 = vmmov %vm4656_vm13  ;;  %vm4661_vm13 = vcmp.lt.s32.totalorder %v3916_v8, 15  ;;  %v3700_v40 = vld [vmem:[%s4562_s3 + $0x10] sm:$0xff] }
 0x21e   : > { %3696 = vmatpush1.msk.msra.mxu0 %vm4658_vm7, %v2384_v17  ;;  %2495 = vmatprep.subr.mxu1 %v2381_v39  ;;  %vm4662_vm8 = vmmov %vm4660_vm12 }
 0x21f   : > { %3698 = vmatpush1.msk.msra.mxu1 %vm4659_vm1, %v2382_v16  ;;  %2529 = vmatprep.mubr.f32.mxu1 %v4652_v31  ;;  %vm4663_vm4 = vmmov %vm4661_vm13  ;;  %vm4666_vm1 = vnez %v4610_v57 }
 0x220   : > { %v2543_v44 = vpop.permute.xlu1 %2542  ;;  %3697 = vmatmul.mubr.msk.f32.vlgmr.msra.gmra.mxu0 %vm4660_vm12, %v3695_v33  ;;  %vm4664_vm7 = vmmov %vm4663_vm4 }
 0x221   : > { %v2550_v59 = vsel %vm4661_vm13, %v2541_v36, %v2543_v44  ;;  %v4394_v45 = vpop.permute.xlu0 %3208  ;;  %3699 = vmatmul.mubr.msk.f32.vlgmr.msra.gmra.mxu1 %vm4662_vm8, %v3695_v33  ;;  %2625 = vmatprep.mubr.f32.mxu0 %v4652_v31  ;;  %vm4665_vm8 = vmmov %vm4663_vm4 }
 0x222   : > { %3701 = vmatprep.subr.msk.mxu0 %vm4031_vm14, %v2550_v59  ;;  %2696 = vmatprep.mubr.f32.mxu1 %v4652_v31  ;;  %v2549_v63 = vsel %vm4665_vm8, %v2543_v44, %v2545_v62  ;;  %vm4667_vm14 = vmmov %vm4660_vm12  ;;  %vm4668_vm12 = vnez %v4614_v61 }
 0x223   : > { %vm4669_vm13 = vmmov %vm4667_vm14 }
 0x224   : > { %v2547_v37 = vpop.permute.xlu1 %2546 }
 0x225   : > { %v2548_v50 = vsel %vm4663_vm4, %v2545_v62, %v2547_v37  ;;  %v2551_v53 = vsel %vm4664_vm7, %v2547_v37, %v2541_v36  ;;  %v2877_v60 = vpop.permute.xlu0 %2876  ;;  %vm4670_vm4 = vcmp.lt.s32.totalorder %v3916_v8, 1 }
 0x226   : > { %3702 = vmatpush1.msk.msra.mxu0 %vm4666_vm1, %v2551_v53  ;;  %3704 = vmatprep.subr.msk.mxu1 %vm4064_vm10, %v2548_v50  ;;  %vm4671_vm10 = vmmov %vm4670_vm4  ;;  %vm4675_vm1 = vcmp.lt.s32.totalorder %v3916_v8, 127 }
 0x227   : > { %3703 = vmatmul.mubr.msk.f32.vlgmr.msra.gmra.mxu0 %vm4667_vm14, %v3700_v40  ;;  %3705 = vmatpush1.msk.msra.mxu1 %vm4668_vm12, %v2549_v63  ;;  %vm4672_vm7 = vmmov %vm4670_vm4  ;;  %v2883_v26 = vsel %vm4675_vm1, %v2877_v60, %v4328_v22 }
 0x228   : > { %3706 = vmatmul.mubr.msk.f32.vlgmr.msra.gmra.mxu1 %vm4669_vm13, %v3700_v40  ;;  %v2710_v51 = vpop.permute.xlu1 %2709  ;;  %2792 = vmatprep.mubr.f32.mxu0 %v4652_v31  ;;  %vm4673_vm8 = vmmov %vm4670_vm4 }
 0x229   : > { %v2717_v4 = vsel %vm4670_vm4, %v4338_v48, %v2710_v51  ;;  %v3044_v14 = vpop.permute.xlu0 %3043  ;;  %2863 = vmatprep.mubr.f32.mxu1 %v4652_v31  ;;  %v2716_v12 = vsel %vm4673_vm8, %v2710_v51, %v4346_v54  ;;  %vm4676_vm14 = vmmov %vm4669_vm13  ;;  %vm4678_vm13 = vnez %v4623_v21 }
 0x22a   : > { %3708 = vmatprep.subr.msk.mxu0 %vm3949_vm5, %v2717_v4  ;;  %vm4674_vm5 = vnez %v4616_v10  ;;  %vm4677_vm12 = vmmov %vm4675_vm1  ;;  %v3714_v10 = vld [vmem:[%s4562_s3 + $0x28] sm:$0xff] }
 0x22b   : > { %v2884_v18 = vsel %vm4677_vm12, %v4361_v2, %v2877_v60  ;;  %vm4679_vm4 = vmmov %vm4676_vm14  ;;  %vm4689_vm12 = vcmp.lt.s32.totalorder %v4189_v47, 256 }
 0x22c   : > { %v2714_v57 = vpop.permute.xlu1 %2713 }
 0x22d   : > { %v2715_v61 = vsel %vm4671_vm10, %v4346_v54, %v2714_v57  ;;  %v2718_v7 = vsel %vm4672_vm7, %v2714_v57, %v4338_v48  ;;  %v3211_v11 = vpop.permute.xlu0 %3210  ;;  %vm4682_vm10 = vmmov %vm4675_vm1  ;;  %vm4683_vm7 = vnez %v4627_v32 }
 0x22e   : > { %3709 = vmatpush1.msk.msra.mxu0 %vm4674_vm5, %v2718_v7  ;;  %3711 = vmatprep.subr.msk.mxu1 %vm3955_vm6, %v2715_v61  ;;  %vm4680_vm6 = vcmp.lt.s32.totalorder %v3916_v8, 113  ;;  %vm4685_vm5 = vmmov %vm4679_vm4 }
 0x22f   : > { %3710 = vmatmul.mubr.msk.f32.vlgmr.msra.gmra.mxu0 %vm4676_vm14, %v3707_v58  ;;  %3712 = vmatpush1.msk.msra.mxu1 %vm4109_vm9, %v2716_v12  ;;  %v3050_v19 = vsel %vm4680_vm6, %v3044_v14, %v4330_v29  ;;  %vm4681_vm9 = vmmov %vm4675_vm1  ;;  %vm4686_vm1 = vcmp.lt.s32.totalorder %v3916_v8, 112 }
 0x230   : > { %3715 = vmatprep.subr.msk.mxu0 %vm4678_vm13, %v2883_v26  ;;  %3713 = vmatmul.mubr.msk.f32.vlgmr.msra.gmra.mxu1 %vm4679_vm4, %v3707_v58  ;;  %v2881_v27 = vpop.permute.xlu1 %2880  ;;  %vm4684_vm8 = vmmov %vm4680_vm6 }
 0x231   : > { %3716 = vmatpush1.msk.msra.mxu0 %vm4038_vm15, %v2884_v18  ;;  %v2882_v13 = vsel %vm4681_vm9, %v4328_v22, %v2881_v27  ;;  %v2885_v21 = vsel %vm4682_vm10, %v2881_v27, %v4361_v2  ;;  %2959 = vmatprep.mubr.f32.mxu0 %v4652_v31  ;;  %v3378_v20 = vpop.permute.xlu0 %3377  ;;  %v3051_v23 = vsel %vm4684_vm8, %v4375_v34, %v3044_v14  ;;  %vm4688_vm14 = vmmov %vm4679_vm4  ;;  %vm4696_vm8 = vcmp.lt.s32.totalorder %v3916_v8, 111 }
 0x232   : > { %3722 = vmatprep.subr.msk.mxu0 %vm4171_vm0, %v3050_v19  ;;  %3718 = vmatprep.subr.msk.mxu1 %vm4683_vm7, %v2885_v21  ;;  %v3217_v22 = vsel %vm4686_vm1, %v3211_v11, %v4332_v30  ;;  %vm4687_vm0 = vnez %v4592_v24  ;;  %vm4690_vm13 = vmmov %vm4680_vm6  ;;  %vm4695_vm7 = vnez %v4594_v25  ;;  %v3384_v47 = vsel %vm4696_vm8, %v3378_v20, %v4334_v41 }
 0x233   : > { %3717 = vmatmul.mubr.msk.f32.vlgmr.msra.gmra.mxu0 %vm4685_vm5, %v3714_v10  ;;  %3719 = vmatpush1.msk.msra.mxu1 %vm4045_vm2, %v2882_v13  ;;  %vm4691_vm4 = vmmov %vm4680_vm6  ;;  %vm4692_vm6 = vnez %v4632_v46  ;;  %v3728_v46 = vld [vmem:[%s4562_s3 + $0x38] sm:$0xff] }
 0x234   : > { %3030 = vmatprep.mubr.f32.mxu1 %v4652_v31  ;;  %3723 = vmatpush1.msk.msra.mxu0 %vm4687_vm0, %v3051_v23  ;;  %v3048_v32 = vpop.permute.xlu1 %3047  ;;  %vm4693_vm9 = vmmov %vm4686_vm1 }
 0x235   : > { %3720 = vmatmul.mubr.msk.f32.vlgmr.msra.gmra.mxu1 %vm4688_vm14, %v3714_v10  ;;  %3729 = vmatprep.subr.msk.mxu0 %vm4689_vm12, %v3217_v22  ;;  %v3049_v35 = vsel %vm4690_vm13, %v4330_v29, %v3048_v32  ;;  %v3052_v36 = vsel %vm4691_vm4, %v3048_v32, %v4375_v34  ;;  %v3218_v24 = vsel %vm4693_vm9, %v4394_v45, %v3211_v11  ;;  %vm4694_vm10 = vmmov %vm4685_vm5  ;;  %v3376_v29 = vpop.permute.xlu0 %3375  ;;  %vm4699_vm14 = vcmp.lt.s32.totalorder %v4698_v1, 256 }
 0x236   : > { %3126 = vmatprep.mubr.f32.mxu0 %v4652_v31  ;;  %3725 = vmatprep.subr.msk.mxu1 %vm4692_vm6, %v3052_v36  ;;  %vm4697_vm0 = vmmov %vm4686_vm1 }
 0x237   : > { %3724 = vmatmul.mubr.msk.f32.vlgmr.msra.gmra.mxu0 %vm4694_vm10, %v3721_v42  ;;  %3726 = vmatpush1.msk.msra.mxu1 %vm4695_vm7, %v3049_v35  ;;  %vm4700_vm12 = vmmov %vm4696_vm8 }
 0x238   : > { %3197 = vmatprep.mubr.f32.mxu1 %v4652_v31  ;;  %3260 = vmatpush1.msra.mxu0 %v3218_v24  ;;  %v3215_v62 = vpop.permute.xlu1 %3214  ;;  %v3385_v48 = vsel %vm4700_vm12, %v3376_v29, %v3378_v20  ;;  %vm4701_vm13 = vmmov %vm4685_vm5 }
 0x239   : > { %3727 = vmatmul.mubr.msk.f32.vlgmr.msra.gmra.mxu1 %vm4685_vm5, %v3721_v42  ;;  %3734 = vmatprep.subr.msk.mxu0 %vm4237_vm11, %v3384_v47  ;;  %v3216_v25 = vsel %vm4686_vm1, %v4332_v30, %v3215_v62  ;;  %v3219_v43 = vsel %vm4697_vm0, %v3215_v62, %v4394_v45  ;;  %v3733_v30 = vld [vmem:[%s4562_s3 + $0x40] sm:$0xff]  ;;  %vm4702_vm11 = vmmov %vm4685_vm5 }
 0x23a   : > { %3293 = vmatprep.mubr.f32.mxu0 %v4652_v31  ;;  %3731 = vmatprep.subr.msk.mxu1 %vm4699_vm14, %v3219_v43  ;;  %vm4703_vm4 = vmmov %vm4696_vm8 }
 0x23b   : > { %3730 = vmatmul.mubr.msk.f32.vlgmr.msra.gmra.mxu0 %vm4701_vm13, %v3728_v46  ;;  %3331 = vmatpush1.msra.mxu1 %v3216_v25  ;;  %vm4704_vm6 = vmmov %vm4703_vm4 }
 0x23c   : > { %3364 = vmatprep.mubr.f32.mxu1 %v4652_v31  ;;  %3735 = vmatpush1.msk.msra.mxu0 %vm4038_vm15, %v3385_v48  ;;  %v3382_v15 = vpop.permute.xlu1 %3381  ;;  %vm4706_vm15 = vmmov %vm4685_vm5 }
 0x23d   : > { %3732 = vmatmul.mubr.msk.f32.vlgmr.msra.gmra.mxu1 %vm4702_vm11, %v3728_v46  ;;  %v3383_v3 = vsel %vm4703_vm4, %v4334_v41, %v3382_v15  ;;  %v3386_v49 = vsel %vm4704_vm6, %v3382_v15, %v3376_v29  ;;  %3460 = vmatprep.mubr.f32.mxu0 %v4652_v31  ;;  %vm4707_vm9 = vmmov %vm4685_vm5 }
 0x23e   : > { %3737 = vmatprep.subr.msk.mxu1 %vm4250_vm3, %v3386_v49  ;;  %3531 = vmatprep.mubr.f32.mxu1 %v4652_v31 }
 0x23f   : > { %3736 = vmatmul.mubr.msk.f32.vlgmr.msra.gmra.mxu0 %vm4706_vm15, %v3733_v30  ;;  %3738 = vmatpush1.msk.msra.mxu1 %vm4045_vm2, %v3383_v3 }
 0x241   : > { %3739 = vmatmul.mubr.msk.f32.vlgmr.msra.gmra.mxu1 %vm4707_vm9, %v3733_v30 }
 0x242   : > { %v3546_v1 = vpop.permute.xlu0 %3545 }
 0x2d8   : > { %v2152_v52 = vpop.f32.mrf.mxu0 }
 0x2d9   : > { %v2223_v54 = vpop.f32.mrf.mxu1 }
 0x2da   : > { %v2154_v41 = vpop.f32.mrf.mxu0 }
 0x2db   : > { %v2225_v56 = vpop.f32.mrf.mxu1 }
 0x2dc   : > { %v2297_v8 = vpop.f32.mrf.mxu0 }
 0x2dd   : > { %v2368_v6 = vpop.f32.mrf.mxu1  ;;  %v2298_v16 = vadd.f32 %v2297_v8, %v2152_v52 }
 0x2de   : > { %v2299_v9 = vpop.f32.mrf.mxu0  ;;  %v2369_v45 = vadd.f32 %v2368_v6, %v2223_v54  ;;  %v3765_v6 = vld [vmem:[%s3835_s24] sm:$0xff] }
 0x2df   : > { %v2370_v2 = vpop.f32.mrf.mxu1  ;;  %v2300_v37 = vadd.f32 %v2299_v9, %v2154_v41 }
 0x2e0   : > { %v2460_v28 = vpop.f32.mrf.mxu0  ;;  %v2371_v53 = vadd.f32 %v2370_v2, %v2225_v56 }
 0x2e1   : > { %v2531_v38 = vpop.f32.mrf.mxu1  ;;  %v2536_v60 = vadd.f32 %v2460_v28, %v2298_v16 }
 0x2e2   : > { %v2462_v0 = vpop.f32.mrf.mxu0  ;;  %v2538_v4 = vadd.f32 %v2531_v38, %v2369_v45 }
 0x2e3   : > { %v2533_v17 = vpop.f32.mrf.mxu1  ;;  %v2537_v14 = vadd.f32 %v2462_v0, %v2300_v37  ;;  %v3766_v0 = vld [vmem:[%s3835_s24 + $0x10] sm:$0xff] }
 0x2e4   : > { %v2539_v7 = vadd.f32 %v2533_v17, %v2371_v53 }
 0x2e7   : > { %v2627_v31 = vpop.f32.mrf.mxu0 }
 0x2e8   : > { %v2698_v34 = vpop.f32.mrf.mxu1  ;;  %v2703_v57 = vadd.f32 %v2627_v31, %v2536_v60  ;;  %v3767_v31 = vld [vmem:[%s3835_s24 + $0x8] sm:$0xff] }
 0x2e9   : > { %v2629_v39 = vpop.f32.mrf.mxu0  ;;  %v2705_v11 = vadd.f32 %v2698_v34, %v2538_v4 }
 0x2ea   : > { %v2700_v33 = vpop.f32.mrf.mxu1  ;;  %v2704_v12 = vadd.f32 %v2629_v39, %v2537_v14 }
 0x2eb   : > { %v2706_v10 = vadd.f32 %v2700_v33, %v2539_v7  ;;  %v3768_v33 = vld [vmem:[%s3835_s24 + $0x18] sm:$0xff] }
 0x2ef   : > { %v2794_v55 = vpop.f32.mrf.mxu0 }
 0x2f0   : > { %v2865_v44 = vpop.f32.mrf.mxu1  ;;  %v2870_v26 = vadd.f32 %v2794_v55, %v2703_v57 }
 0x2f1   : > { %v2796_v59 = vpop.f32.mrf.mxu0  ;;  %v2872_v19 = vadd.f32 %v2865_v44, %v2705_v11 }
 0x2f2   : > { %v2867_v40 = vpop.f32.mrf.mxu1  ;;  %v2871_v13 = vadd.f32 %v2796_v59, %v2704_v12 }
 0x2f3   : > { %v2961_v50 = vpop.f32.mrf.mxu0  ;;  %v2873_v22 = vadd.f32 %v2867_v40, %v2706_v10 }
 0x2f4   : > { %v3037_v21 = vadd.f32 %v2961_v50, %v2870_v26 }
 0x2f5   : > { %v3032_v63 = vpop.f32.mrf.mxu1  ;;  %v2963_v51 = vpop.f32.mrf.mxu0 }
 0x2f6   : > { %v3039_v32 = vadd.f32 %v3032_v63, %v2872_v19  ;;  %v3038_v42 = vadd.f32 %v2963_v51, %v2871_v13 }
 0x2f7   : > { %v3034_v58 = vpop.f32.mrf.mxu1  ;;  %v3128_v61 = vpop.f32.mrf.mxu0 }
 0x2f8   : > { %v3204_v35 = vadd.f32 %v3128_v61, %v3037_v21  ;;  %v3040_v47 = vadd.f32 %v3034_v58, %v2873_v22 }
 0x2f9   : > { %v3199_v18 = vpop.f32.mrf.mxu1  ;;  %v3130_v27 = vpop.f32.mrf.mxu0 }
 0x2fa   : > { %v3206_v29 = vadd.f32 %v3199_v18, %v3039_v32  ;;  %v3205_v62 = vadd.f32 %v3130_v27, %v3038_v42 }
 0x2fb   : > { %v3201_v20 = vpop.f32.mrf.mxu1  ;;  %v3295_v23 = vpop.f32.mrf.mxu0 }
 0x2fc   : > { %v3371_v46 = vadd.f32 %v3295_v23, %v3204_v35  ;;  %v3207_v48 = vadd.f32 %v3201_v20, %v3040_v47 }
 0x2fd   : > { %v3366_v36 = vpop.f32.mrf.mxu1  ;;  %v3297_v24 = vpop.f32.mrf.mxu0 }
 0x2fe   : > { %v3373_v15 = vadd.f32 %v3366_v36, %v3206_v29  ;;  %v3372_v30 = vadd.f32 %v3297_v24, %v3205_v62 }
 0x2ff   : > { %v3368_v25 = vpop.f32.mrf.mxu1  ;;  %v3462_v43 = vpop.f32.mrf.mxu0 }
 0x300   : > { %v3538_v3 = vadd.f32 %v3462_v43, %v3371_v46  ;;  %v3374_v52 = vadd.f32 %v3368_v25, %v3207_v48 }
 0x301   : > { %v3533_v49 = vpop.f32.mrf.mxu1  ;;  %v3464_v5 = vpop.f32.mrf.mxu0 }
 0x302   : > { %v3548_v54 = vadd.f32 %v3546_v1, %v3538_v3  ;;  %v3540_v41 = vadd.f32 %v3533_v49, %v3373_v15  ;;  %v3539_v56 = vadd.f32 %v3464_v5, %v3372_v30 }
 0x303   : > { %v3535_v8 = vpop.f32.mrf.mxu1 }
 0x304   : > { %v3552_v9 = vadd.f32 %v3765_v6, %v3548_v54  ;;  %v3550_v2 = vadd.f32 %v3546_v1, %v3540_v41  ;;  %v3549_v28 = vadd.f32 %v3546_v1, %v3539_v56  ;;  %v3541_v38 = vadd.f32 %v3535_v8, %v3374_v52 }
 0x306   : > { %3556 = vst [vmem:[%s231_s26] sm:$0xff] %v3552_v9  ;;  %v3554_v17 = vadd.f32 %v3766_v0, %v3550_v2  ;;  %v3553_v34 = vadd.f32 %v3767_v31, %v3549_v28  ;;  %v3551_v39 = vadd.f32 %v3546_v1, %v3541_v38 }
 0x308   : > { %3740 = vst [vmem:[%s231_s26 + $0x10] sm:$0xff] %v3554_v17  ;;  %3557 = vst [vmem:[%s231_s26 + $0x8] sm:$0xff] %v3553_v34  ;;  %v3555_v55 = vadd.f32 %v3768_v33, %v3551_v39 }
 0x30a   : > { %3741 = vst [vmem:[%s231_s26 + $0x18] sm:$0xff] %v3555_v55 }
 0x30b PF: > { %s15_s18 = sadd.s32 1, %s3775_s18  }
 0x30c   : > { %p12_p4 = scmp.ge.s32.totalorder %s15_s18, 6  }
 0x30e   :  { %14 = sbr.rel (!%p12_p4) target bundleno = 1 (0x1), region = 88 }

</bundles_post_ra>
